<compile_context>
chip_gen: v7x
topology: tpu7x:2x2x1
jax: 0.10.0
libtpu: 0.0.40
codegen_flags: <defaults>
</compile_context>

<pallas_src>
import functools

import jax
import jax.numpy as jnp
from jax.experimental import pallas as pl
from jax.experimental.pallas import tpu as pltpu


def _round_up(v, m):
    return ((v + m - 1) // m) * m


# ----------------------------- Pallas kernel ----------------------------------

def _graphsage_graph_kernel(a_ref, x0_ref, pool_ref, w0_ref, shift0_ref,
                            w_ref, shift_ref, lw_ref, lb_ref, o_ref, x_scr,
                            *, num_layers, hpad):
    """One grid step = one graph of the batched (block-diagonal) graph.

    a_ref:      [1, G, G]            row-normalized adjacency block (bf16, zero-padded)
    x0_ref:     [1, G, K0]           padded input node features (bf16)
    pool_ref:   [1, G, 1]            1.0 for real node rows, 0.0 for padding (f32)
    w0_ref:     [2, K0, Hp]          layer-0 [W_self; W_neigh], BN-scale folded (bf16)
    shift0_ref: [1, Hp]              layer-0 folded BN shift (+bias)            (f32)
    w_ref:      [L-1, 2*Hp, Hp]      stacked [W_self; W_neigh] layers 1..L-1, scale folded (bf16)
    shift_ref:  [L-1, 1, Hp]         folded shifts for layers 1..L-1 (last layer = bias) (f32)
    lw_ref:     [Hp, Op]             final Linear weight (f32)
    lb_ref:     [1, Op]              final Linear bias   (f32)
    o_ref:      [1, 8, Op]           per-graph logits (row-broadcast; row 0 used) (f32)
    x_scr:      [G, 2*Hp] bf16       cols [:Hp] = activation, cols [Hp:] = h_neigh
    """
    a = a_ref[0]                                   # [G, G]  bf16
    x0 = x0_ref[0]                                 # [G, K0] bf16

    # ---- layer 0: read inputs straight from x0 (its own K padding), two dots summed ----
    h0 = jnp.dot(a, x0, preferred_element_type=jnp.float32).astype(jnp.bfloat16)
    out = (jnp.dot(x0, w0_ref[0], preferred_element_type=jnp.float32)
           + jnp.dot(h0, w0_ref[1], preferred_element_type=jnp.float32)
           + shift0_ref[...])                      # [G, Hp] f32, BN already folded

    # ---- layers 1 .. L-1: fused K = 2*Hp dot straight out of the resident scratch ----
    for l in range(1, num_layers):                 # static unroll over layers
        # relu of the previous (non-last) layer; dropout = identity in eval mode
        x_scr[:, :hpad] = jnp.maximum(out, 0.0).astype(jnp.bfloat16)
        x_scr[:, hpad:] = jnp.dot(a, x_scr[:, :hpad],
                                  preferred_element_type=jnp.float32).astype(jnp.bfloat16)
        out = jnp.dot(x_scr[...], w_ref[l - 1],
                      preferred_element_type=jnp.float32) + shift_ref[l - 1]

    # ---- SumPooling (mask out padded node rows, f32) + final Linear ----
    hg = jnp.sum(out * pool_ref[0], axis=0, keepdims=True)          # [1, Hp] f32
    res = jnp.dot(hg, lw_ref[...], preferred_element_type=jnp.float32) + lb_ref[...]
    o_ref[0] = jnp.broadcast_to(res, o_ref.shape[1:])               # lane-dense full store


# ------------------------------ wrapper ----------------------------------------

def graphsage_forward(a_norm, x, params, graph_offsets, graph_sizes):
    """Full GraphSAGEClassifier forward (eval mode), per-graph-tiled pallas_call.

    graph_offsets / graph_sizes: static Python ints describing the contiguous node range
    of each graph in the batched block-diagonal graph (DGL batching convention).
    """
    f32, bf16 = jnp.float32, jnp.bfloat16
    n, in_feats = x.shape
    num_graphs = len(graph_sizes)
    num_layers = len(params["sage"])
    assert num_layers >= 2
    hidden = params["sage"][0]["w_self"].shape[1]
    out_dim = params["lin_w"].shape[1]

    # Lane-dense padded dims (multiples of 128; bump to 256 on v6e/v7x if hidden >= 256).
    kpad0 = _round_up(in_feats, 128)
    hpad = _round_up(hidden, 128)
    opad = _round_up(out_dim, 128)
    gpad = _round_up(max(graph_sizes), 128)

    # ---- per-graph input blocks (block-diagonal adjacency -> one block per graph) ----
    a_blocks = jnp.zeros((num_graphs, gpad, gpad), f32)
    x_blocks = jnp.zeros((num_graphs, gpad, kpad0), f32)
    pool_blocks = jnp.zeros((num_graphs, gpad, 1), f32)
    for b, (off, sz) in enumerate(zip(graph_offsets, graph_sizes)):
        a_blocks = a_blocks.at[b, :sz, :sz].set(a_norm[off:off + sz, off:off + sz])
        x_blocks = x_blocks.at[b, :sz, :in_feats].set(x[off:off + sz])
        pool_blocks = pool_blocks.at[b, :sz, 0].set(1.0)
    a_blocks = a_blocks.astype(bf16)
    x_blocks = x_blocks.astype(bf16)

    # ---- parameter packing: fold BN scale into weight columns, bias into shift ----
    def _scale_shift(layer_idx):
        bias = params["sage"][layer_idx]["bias"].reshape(-1)
        if layer_idx < num_layers - 1:
            bn = params["bn"][layer_idx]
            s = bn["gamma"] / jnp.sqrt(bn["running_var"] + 1e-5)
            sh = bn["beta"] - bn["running_mean"] * s + bias * s
        else:
            s = jnp.ones((hidden,), f32)
            sh = bias
        return s, sh

    # layer 0 (in_feats -> hidden), its own K padding
    s0, sh0 = _scale_shift(0)
    w0 = jnp.zeros((2, kpad0, hpad), f32)
    w0 = w0.at[0, :in_feats, :hidden].set(params["sage"][0]["w_self"] * s0)
    w0 = w0.at[1, :in_feats, :hidden].set(params["sage"][0]["w_neigh"] * s0)
    w0 = w0.astype(bf16)
    shift0 = jnp.zeros((1, hpad), f32).at[0, :hidden].set(sh0)

    # layers 1..L-1 (hidden -> hidden), stacked [W_self ; W_neigh] to match scratch layout
    w_rest, shift_rest = [], []
    for l in range(1, num_layers):
        s, sh = _scale_shift(l)
        wblk = jnp.zeros((2 * hpad, hpad), f32)
        wblk = wblk.at[:hidden, :hidden].set(params["sage"][l]["w_self"] * s)
        wblk = wblk.at[hpad:hpad + hidden, :hidden].set(params["sage"][l]["w_neigh"] * s)
        w_rest.append(wblk)
        shift_rest.append(jnp.zeros((1, hpad), f32).at[0, :hidden].set(sh))
    w_all = jnp.stack(w_rest, axis=0).astype(bf16)          # [L-1, 2*Hp, Hp]
    shift_all = jnp.stack(shift_rest, axis=0)               # [L-1, 1, Hp]

    lw_p = jnp.zeros((hpad, opad), f32).at[:hidden, :out_dim].set(params["lin_w"])
    lb_p = jnp.zeros((1, opad), f32).at[:, :out_dim].set(params["lin_b"].reshape(1, -1))

    # ---- VMEM budget (double-buffered per-graph blocks + resident weights + scratch) ----
    resident = (2 * (gpad * gpad + gpad * kpad0) * 2          # a, x blocks (bf16, 2 bufs)
                + 2 * gpad * 4                                 # pool column (f32, 2 bufs)
                + 2 * 8 * opad * 4                             # output block (f32, 2 bufs)
                + 2 * (w0.size + w_all.size) * 2               # weights (bf16)
                + 2 * (shift0.size + shift_all.size + lw_p.size + lb_p.size) * 4
                + gpad * 2 * hpad * 2)                         # activation scratch (bf16)
    vmem_limit = int(min(64 << 20, max(16 << 20, 2 * resident + (4 << 20))))

    # ---- advisory cost estimate ----
    flops_per_graph = (2 * gpad * gpad * kpad0 + 2 * 2 * gpad * kpad0 * hpad
                       + (num_layers - 1) * (2 * gpad * gpad * hpad
                                             + 2 * gpad * (2 * hpad) * hpad)
                       + 2 * gpad * hpad + 2 * hpad * opad)
    bytes_accessed = ((a_blocks.size + x_blocks.size + w0.size + w_all.size) * 2
                      + (pool_blocks.size + shift0.size + shift_all.size
                         + lw_p.size + lb_p.size + num_graphs * 8 * opad) * 4)
    cost = pl.CostEstimate(flops=num_graphs * flops_per_graph, transcendentals=0,
                           bytes_accessed=bytes_accessed)

    kernel = functools.partial(_graphsage_graph_kernel,
                               num_layers=num_layers, hpad=hpad)

    out_padded = pl.pallas_call(
        kernel,
        out_shape=jax.ShapeDtypeStruct((num_graphs, 8, opad), jnp.float32),
        grid=(num_graphs,),
        in_specs=[
            pl.BlockSpec((1, gpad, gpad), lambda b: (b, 0, 0)),            # adjacency block
            pl.BlockSpec((1, gpad, kpad0), lambda b: (b, 0, 0)),           # input features
            pl.BlockSpec((1, gpad, 1), lambda b: (b, 0, 0)),               # node mask
            pl.BlockSpec((2, kpad0, hpad), lambda b: (0, 0, 0)),           # layer-0 weights
            pl.BlockSpec((1, hpad), lambda b: (0, 0)),                     # layer-0 shift
            pl.BlockSpec((num_layers - 1, 2 * hpad, hpad), lambda b: (0, 0, 0)),
            pl.BlockSpec((num_layers - 1, 1, hpad), lambda b: (0, 0, 0)),
            pl.BlockSpec((hpad, opad), lambda b: (0, 0)),                  # linear weight
            pl.BlockSpec((1, opad), lambda b: (0, 0)),                     # linear bias
        ],
        out_specs=pl.BlockSpec((1, 8, opad), lambda b: (b, 0, 0)),
        scratch_shapes=[pltpu.VMEM((gpad, 2 * hpad), jnp.bfloat16)],
        compiler_params=pltpu.CompilerParams(
            dimension_semantics=("parallel",),
            vmem_limit_bytes=vmem_limit),
        cost_estimate=cost,
    )(a_blocks, x_blocks, pool_blocks, w0, shift0, w_all, shift_all, lw_p, lb_p)

    return out_padded[:, 0, :out_dim]


# --------------------------- pure-JAX reference ---------------------------------

def _reference_forward(a_norm, pool_mat, x, params):
    num_layers = len(params["sage"])
    h = x
    for l, layer in enumerate(params["sage"]):
        h_neigh = a_norm @ h
        out = h @ layer["w_self"] + h_neigh @ layer["w_neigh"] + layer["bias"]
        if l < num_layers - 1:
            bn = params["bn"][l]
            scale = bn["gamma"] / jnp.sqrt(bn["running_var"] + 1e-5)
            shift = bn["beta"] - bn["running_mean"] * scale
            out = jnp.maximum(out * scale + shift, 0.0)
        h = out
    hg = pool_mat @ h
    return hg @ params["lin_w"] + params["lin_b"]


# ------------------------------ main -------------------------------------------

def _init_params(key, in_feats, hidden_dim, out_dim, num_layers):
    params = {"sage": [], "bn": []}
    dims = [in_feats] + [hidden_dim] * num_layers
    for li in range(num_layers):
        key, k1, k2, k3 = jax.random.split(key, 4)
        fin, fout = dims[li], dims[li + 1]
        params["sage"].append({
            "w_self": 0.1 * jax.random.normal(k1, (fin, fout), jnp.float32),
            "w_neigh": 0.1 * jax.random.normal(k2, (fin, fout), jnp.float32),
            "bias": 0.1 * jax.random.normal(k3, (1, fout), jnp.float32),
        })
        if li < num_layers - 1:
            key, kg, kb = jax.random.split(key, 3)
            params["bn"].append({
                "gamma": 1.0 + 0.1 * jax.random.normal(kg, (fout,), jnp.float32),
                "beta": 0.1 * jax.random.normal(kb, (fout,), jnp.float32),
                "running_mean": jnp.zeros((fout,), jnp.float32),
                "running_var": jnp.ones((fout,), jnp.float32),
            })
    key, kw, kb = jax.random.split(key, 3)
    params["lin_w"] = 0.1 * jax.random.normal(kw, (hidden_dim, out_dim), jnp.float32)
    params["lin_b"] = 0.1 * jax.random.normal(kb, (1, out_dim), jnp.float32)
    return params


if __name__ == "__main__":
    # Small shapes: 2 graphs of 16 nodes each (N=32), in_feats=16, hidden=32, out=8.
    N, IN_FEATS, HIDDEN, OUT_DIM, NUM_LAYERS = 32, 16, 32, 8, 3
    NUM_GRAPHS = 2
    GRAPH_OFFSETS = (0, 16)
    GRAPH_SIZES = (16, 16)

    key = jax.random.PRNGKey(0)
    key, k_adj, k_feat, k_param = jax.random.split(key, 4)

    # Deterministic random graph (block-diagonal over the 2 graphs).
    adj = (jax.random.uniform(k_adj, (N, N)) < 0.2).astype(jnp.float32)
    adj = adj * (1.0 - jnp.eye(N, dtype=jnp.float32))  # no self loops
    half = N // NUM_GRAPHS
    block = jnp.zeros((N, N), jnp.float32)
    block = block.at[:half, :half].set(1.0).at[half:, half:].set(1.0)
    adj = adj * block
    deg = jnp.clip(jnp.sum(adj, axis=1, keepdims=True), 1.0, None)
    a_norm = adj / deg                                   # mean aggregation matrix

    # Sum-pooling membership matrix (reference only).
    pool_mat = jnp.zeros((NUM_GRAPHS, N), jnp.float32)
    pool_mat = pool_mat.at[0, :half].set(1.0).at[1, half:].set(1.0)

    x = jax.random.normal(k_feat, (N, IN_FEATS), jnp.float32)
    params = _init_params(k_param, IN_FEATS, HIDDEN, OUT_DIM, NUM_LAYERS)

    fwd = jax.jit(lambda a, xx: graphsage_forward(a, xx, params, GRAPH_OFFSETS, GRAPH_SIZES))
    out = fwd(a_norm, x)
    out = jax.block_until_ready(out)

    assert out.shape == (NUM_GRAPHS, OUT_DIM)
    assert jnp.all(jnp.isfinite(out))

    # Loose check vs. f32 reference (kernel uses bf16 MXU inputs, f32 accumulation).
    ref = _reference_forward(a_norm, pool_mat, x, params)
    assert jnp.max(jnp.abs(out - ref)) < 0.25, f"max abs diff {jnp.max(jnp.abs(out - ref))}"

    print("KERNEL_OK")
</pallas_src>

<mosaic_0001>
module attributes {stable_mosaic.version = 11 : i64} {
  func.func @_graphsage_graph_kernel(%arg0: i32, %arg1: memref<1x128x128xbf16, #tpu.memory_space<vmem>>, %arg2: memref<1x128x128xbf16, #tpu.memory_space<vmem>>, %arg3: memref<1x128x1xf32, #tpu.memory_space<vmem>>, %arg4: memref<2x128x128xbf16, #tpu.memory_space<vmem>>, %arg5: memref<1x128xf32, #tpu.memory_space<vmem>>, %arg6: memref<2x256x128xbf16, #tpu.memory_space<vmem>>, %arg7: memref<2x1x128xf32, #tpu.memory_space<vmem>>, %arg8: memref<128x128xf32, #tpu.memory_space<vmem>>, %arg9: memref<1x128xf32, #tpu.memory_space<vmem>>, %arg10: memref<1x8x128xf32, #tpu.memory_space<vmem>>, %arg11: memref<128x256xbf16, #tpu.memory_space<vmem>>) attributes {dimension_semantics = [#tpu.dimension_semantics<parallel>], iteration_bounds = array<i64: 2>, scalar_prefetch = 0 : i64, scratch_operands = 1 : i64, tpu.core_type = #tpu.core_type<tc>, window_params = [{transform_indices = @transform_0, window_bounds = array<i64: 1, 128, 128>}, {transform_indices = @transform_1, window_bounds = array<i64: 1, 128, 128>}, {transform_indices = @transform_2, window_bounds = array<i64: 1, 128, 1>}, {pipeline_mode = #tpu.pipeline_mode<synchronous>, transform_indices = @transform_3, window_bounds = array<i64: 2, 128, 128>}, {pipeline_mode = #tpu.pipeline_mode<synchronous>, transform_indices = @transform_4, window_bounds = array<i64: 1, 128>}, {pipeline_mode = #tpu.pipeline_mode<synchronous>, transform_indices = @transform_5, window_bounds = array<i64: 2, 256, 128>}, {pipeline_mode = #tpu.pipeline_mode<synchronous>, transform_indices = @transform_6, window_bounds = array<i64: 2, 1, 128>}, {pipeline_mode = #tpu.pipeline_mode<synchronous>, transform_indices = @transform_7, window_bounds = array<i64: 128, 128>}, {pipeline_mode = #tpu.pipeline_mode<synchronous>, transform_indices = @transform_8, window_bounds = array<i64: 1, 128>}, {transform_indices = @transform_9, window_bounds = array<i64: 1, 8, 128>}]} {
    %c0 = arith.constant 0 : index
    %c0_0 = arith.constant 0 : index
    %c0_1 = arith.constant 0 : index
    %0 = vector.load %arg1[%c0, %c0_0, %c0_1] : memref<1x128x128xbf16, #tpu.memory_space<vmem>>, vector<1x128x128xbf16>
    %1 = vector.shape_cast %0 : vector<1x128x128xbf16> to vector<128x128xbf16>
    %c0_2 = arith.constant 0 : index
    %c0_3 = arith.constant 0 : index
    %c0_4 = arith.constant 0 : index
    %2 = vector.load %arg2[%c0_2, %c0_3, %c0_4] : memref<1x128x128xbf16, #tpu.memory_space<vmem>>, vector<1x128x128xbf16>
    %3 = vector.shape_cast %2 : vector<1x128x128xbf16> to vector<128x128xbf16>
    %cst = arith.constant dense<0.000000e+00> : vector<128x128xf32>
    %4 = tpu.matmul %1, %3, %cst {dimension_numbers = #tpu.dot_dimension_numbers<[1], [0], [0], [1], [0, 0, 1, 1], [], []>} : vector<128x128xbf16>, vector<128x128xbf16>, vector<128x128xf32> -> vector<128x128xf32>
    %5 = arith.truncf %4 : vector<128x128xf32> to vector<128x128xbf16>
    %c0_5 = arith.constant 0 : index
    %c0_6 = arith.constant 0 : index
    %c0_7 = arith.constant 0 : index
    %6 = vector.load %arg4[%c0_5, %c0_6, %c0_7] : memref<2x128x128xbf16, #tpu.memory_space<vmem>>, vector<1x128x128xbf16>
    %7 = vector.shape_cast %6 : vector<1x128x128xbf16> to vector<128x128xbf16>
    %cst_8 = arith.constant dense<0.000000e+00> : vector<128x128xf32>
    %8 = tpu.matmul %3, %7, %cst_8 {dimension_numbers = #tpu.dot_dimension_numbers<[1], [0], [0], [1], [0, 0, 1, 1], [], []>} : vector<128x128xbf16>, vector<128x128xbf16>, vector<128x128xf32> -> vector<128x128xf32>
    %c1 = arith.constant 1 : index
    %c0_9 = arith.constant 0 : index
    %c0_10 = arith.constant 0 : index
    %9 = vector.load %arg4[%c1, %c0_9, %c0_10] : memref<2x128x128xbf16, #tpu.memory_space<vmem>>, vector<1x128x128xbf16>
    %10 = vector.shape_cast %9 : vector<1x128x128xbf16> to vector<128x128xbf16>
    %cst_11 = arith.constant dense<0.000000e+00> : vector<128x128xf32>
    %11 = tpu.matmul %5, %10, %cst_11 {dimension_numbers = #tpu.dot_dimension_numbers<[1], [0], [0], [1], [0, 0, 1, 1], [], []>} : vector<128x128xbf16>, vector<128x128xbf16>, vector<128x128xf32> -> vector<128x128xf32>
    %12 = arith.addf %8, %11 : vector<128x128xf32>
    %c0_12 = arith.constant 0 : index
    %c0_13 = arith.constant 0 : index
    %13 = vector.load %arg5[%c0_12, %c0_13] : memref<1x128xf32, #tpu.memory_space<vmem>>, vector<1x128xf32>
    %14 = vector.broadcast %13 : vector<1x128xf32> to vector<128x128xf32>
    %15 = arith.addf %12, %14 : vector<128x128xf32>
    %cst_14 = arith.constant 0.000000e+00 : f32
    %16 = vector.broadcast %cst_14 : f32 to vector<128x128xf32>
    %17 = arith.maximumf %15, %16 : vector<128x128xf32>
    %18 = arith.truncf %17 : vector<128x128xf32> to vector<128x128xbf16>
    %c0_15 = arith.constant 0 : index
    %c0_16 = arith.constant 0 : index
    %19 = vector.load %arg11[%c0_15, %c0_16] : memref<128x256xbf16, #tpu.memory_space<vmem>>, vector<128x128xbf16>
    tpu.vector_store %arg11[%c0_15, %c0_16], %18 {strides = array<i32>} : memref<128x256xbf16, #tpu.memory_space<vmem>>, vector<128x128xbf16>,
    %c0_17 = arith.constant 0 : index
    %c0_18 = arith.constant 0 : index
    %20 = vector.load %arg11[%c0_17, %c0_18] : memref<128x256xbf16, #tpu.memory_space<vmem>>, vector<128x128xbf16>
    %cst_19 = arith.constant dense<0.000000e+00> : vector<128x128xf32>
    %21 = tpu.matmul %1, %20, %cst_19 {dimension_numbers = #tpu.dot_dimension_numbers<[1], [0], [0], [1], [0, 0, 1, 1], [], []>} : vector<128x128xbf16>, vector<128x128xbf16>, vector<128x128xf32> -> vector<128x128xf32>
    %22 = arith.truncf %21 : vector<128x128xf32> to vector<128x128xbf16>
    %c0_20 = arith.constant 0 : index
    %c128 = arith.constant 128 : index
    %23 = vector.load %arg11[%c0_20, %c128] : memref<128x256xbf16, #tpu.memory_space<vmem>>, vector<128x128xbf16>
    tpu.vector_store %arg11[%c0_20, %c128], %22 {strides = array<i32>} : memref<128x256xbf16, #tpu.memory_space<vmem>>, vector<128x128xbf16>,
    %c0_21 = arith.constant 0 : index
    %c0_22 = arith.constant 0 : index
    %24 = vector.load %arg11[%c0_21, %c0_22] : memref<128x256xbf16, #tpu.memory_space<vmem>>, vector<128x256xbf16>
    %c0_23 = arith.constant 0 : index
    %c0_24 = arith.constant 0 : index
    %c0_25 = arith.constant 0 : index
    %25 = vector.load %arg6[%c0_23, %c0_24, %c0_25] : memref<2x256x128xbf16, #tpu.memory_space<vmem>>, vector<1x256x128xbf16>
    %26 = vector.shape_cast %25 : vector<1x256x128xbf16> to vector<256x128xbf16>
    %cst_26 = arith.constant dense<0.000000e+00> : vector<128x128xf32>
    %27 = tpu.matmul %24, %26, %cst_26 {dimension_numbers = #tpu.dot_dimension_numbers<[1], [0], [0], [1], [0, 0, 1, 1], [], []>} : vector<128x256xbf16>, vector<256x128xbf16>, vector<128x128xf32> -> vector<128x128xf32>
    %c0_27 = arith.constant 0 : index
    %c0_28 = arith.constant 0 : index
    %c0_29 = arith.constant 0 : index
    %28 = vector.load %arg7[%c0_27, %c0_28, %c0_29] : memref<2x1x128xf32, #tpu.memory_space<vmem>>, vector<1x1x128xf32>
    %29 = vector.shape_cast %28 : vector<1x1x128xf32> to vector<1x128xf32>
    %30 = vector.broadcast %29 : vector<1x128xf32> to vector<128x128xf32>
    %31 = arith.addf %27, %30 : vector<128x128xf32>
    %cst_30 = arith.constant 0.000000e+00 : f32
    %32 = vector.broadcast %cst_30 : f32 to vector<128x128xf32>
    %33 = arith.maximumf %31, %32 : vector<128x128xf32>
    %34 = arith.truncf %33 : vector<128x128xf32> to vector<128x128xbf16>
    %c0_31 = arith.constant 0 : index
    %c0_32 = arith.constant 0 : index
    %35 = vector.load %arg11[%c0_31, %c0_32] : memref<128x256xbf16, #tpu.memory_space<vmem>>, vector<128x128xbf16>
    tpu.vector_store %arg11[%c0_31, %c0_32], %34 {strides = array<i32>} : memref<128x256xbf16, #tpu.memory_space<vmem>>, vector<128x128xbf16>,
    %c0_33 = arith.constant 0 : index
    %c0_34 = arith.constant 0 : index
    %36 = vector.load %arg11[%c0_33, %c0_34] : memref<128x256xbf16, #tpu.memory_space<vmem>>, vector<128x128xbf16>
    %cst_35 = arith.constant dense<0.000000e+00> : vector<128x128xf32>
    %37 = tpu.matmul %1, %36, %cst_35 {dimension_numbers = #tpu.dot_dimension_numbers<[1], [0], [0], [1], [0, 0, 1, 1], [], []>} : vector<128x128xbf16>, vector<128x128xbf16>, vector<128x128xf32> -> vector<128x128xf32>
    %38 = arith.truncf %37 : vector<128x128xf32> to vector<128x128xbf16>
    %c0_36 = arith.constant 0 : index
    %c128_37 = arith.constant 128 : index
    %39 = vector.load %arg11[%c0_36, %c128_37] : memref<128x256xbf16, #tpu.memory_space<vmem>>, vector<128x128xbf16>
    tpu.vector_store %arg11[%c0_36, %c128_37], %38 {strides = array<i32>} : memref<128x256xbf16, #tpu.memory_space<vmem>>, vector<128x128xbf16>,
    %c0_38 = arith.constant 0 : index
    %c0_39 = arith.constant 0 : index
    %40 = vector.load %arg11[%c0_38, %c0_39] : memref<128x256xbf16, #tpu.memory_space<vmem>>, vector<128x256xbf16>
    %c1_40 = arith.constant 1 : index
    %c0_41 = arith.constant 0 : index
    %c0_42 = arith.constant 0 : index
    %41 = vector.load %arg6[%c1_40, %c0_41, %c0_42] : memref<2x256x128xbf16, #tpu.memory_space<vmem>>, vector<1x256x128xbf16>
    %42 = vector.shape_cast %41 : vector<1x256x128xbf16> to vector<256x128xbf16>
    %cst_43 = arith.constant dense<0.000000e+00> : vector<128x128xf32>
    %43 = tpu.matmul %40, %42, %cst_43 {dimension_numbers = #tpu.dot_dimension_numbers<[1], [0], [0], [1], [0, 0, 1, 1], [], []>} : vector<128x256xbf16>, vector<256x128xbf16>, vector<128x128xf32> -> vector<128x128xf32>
    %c1_44 = arith.constant 1 : index
    %c0_45 = arith.constant 0 : index
    %c0_46 = arith.constant 0 : index
    %44 = vector.load %arg7[%c1_44, %c0_45, %c0_46] : memref<2x1x128xf32, #tpu.memory_space<vmem>>, vector<1x1x128xf32>
    %45 = vector.shape_cast %44 : vector<1x1x128xf32> to vector<1x128xf32>
    %46 = vector.broadcast %45 : vector<1x128xf32> to vector<128x128xf32>
    %47 = arith.addf %43, %46 : vector<128x128xf32>
    %c0_47 = arith.constant 0 : index
    %c0_48 = arith.constant 0 : index
    %c0_49 = arith.constant 0 : index
    %48 = vector.load %arg3[%c0_47, %c0_48, %c0_49] : memref<1x128x1xf32, #tpu.memory_space<vmem>>, vector<1x128x1xf32>
    %49 = vector.shape_cast %48 : vector<1x128x1xf32> to vector<128x1xf32>
    %50 = vector.broadcast %49 : vector<128x1xf32> to vector<128x128xf32>
    %51 = arith.mulf %47, %50 : vector<128x128xf32>
    %cst_50 = arith.constant dense<0.000000e+00> : vector<128xf32>
    %52 = vector.multi_reduction <add>, %51, %cst_50 [0] : vector<128x128xf32> to vector<128xf32>
    %53 = vector.shape_cast %52 : vector<128xf32> to vector<1x128xf32>
    %c0_51 = arith.constant 0 : index
    %c0_52 = arith.constant 0 : index
    %54 = vector.load %arg8[%c0_51, %c0_52] : memref<128x128xf32, #tpu.memory_space<vmem>>, vector<128x128xf32>
    %cst_53 = arith.constant dense<0.000000e+00> : vector<1x128xf32>
    %55 = tpu.matmul %53, %54, %cst_53 {dimension_numbers = #tpu.dot_dimension_numbers<[1], [0], [0], [1], [0, 0, 1, 1], [], []>} : vector<1x128xf32>, vector<128x128xf32>, vector<1x128xf32> -> vector<1x128xf32>
    %c0_54 = arith.constant 0 : index
    %c0_55 = arith.constant 0 : index
    %56 = vector.load %arg9[%c0_54, %c0_55] : memref<1x128xf32, #tpu.memory_space<vmem>>, vector<1x128xf32>
    %57 = arith.addf %55, %56 : vector<1x128xf32>
    %58 = vector.shape_cast %57 : vector<1x128xf32> to vector<1x128xf32>
    %59 = vector.broadcast %58 : vector<1x128xf32> to vector<8x128xf32>
    %c0_56 = arith.constant 0 : index
    %c0_57 = arith.constant 0 : index
    %c0_58 = arith.constant 0 : index
    %60 = vector.load %arg10[%c0_56, %c0_57, %c0_58] : memref<1x8x128xf32, #tpu.memory_space<vmem>>, vector<1x8x128xf32>
    %61 = vector.shape_cast %60 : vector<1x8x128xf32> to vector<8x128xf32>
    %62 = vector.shape_cast %59 : vector<8x128xf32> to vector<1x8x128xf32>
    tpu.vector_store %arg10[%c0_56, %c0_57, %c0_58], %62 {strides = array<i32>} : memref<1x8x128xf32, #tpu.memory_space<vmem>>, vector<1x8x128xf32>,
    return
  }
  func.func @transform_0(%arg0: i32) -> (i32, i32, i32) {
    %c0_i32 = arith.constant 0 : i32
    %c0_i32_0 = arith.constant 0 : i32
    %c0_i32_1 = arith.constant 0 : i32
    return %arg0, %c0_i32, %c0_i32_0 : i32, i32, i32
  }
  func.func @transform_1(%arg0: i32) -> (i32, i32, i32) {
    %c0_i32 = arith.constant 0 : i32
    %c0_i32_0 = arith.constant 0 : i32
    %c0_i32_1 = arith.constant 0 : i32
    return %arg0, %c0_i32, %c0_i32_0 : i32, i32, i32
  }
  func.func @transform_2(%arg0: i32) -> (i32, i32, i32) {
    %c0_i32 = arith.constant 0 : i32
    %c0_i32_0 = arith.constant 0 : i32
    %c0_i32_1 = arith.constant 0 : i32
    return %arg0, %c0_i32, %c0_i32_0 : i32, i32, i32
  }
  func.func @transform_3(%arg0: i32) -> (i32, i32, i32) {
    %c0_i32 = arith.constant 0 : i32
    %c0_i32_0 = arith.constant 0 : i32
    %c0_i32_1 = arith.constant 0 : i32
    %c0_i32_2 = arith.constant 0 : i32
    return %c0_i32, %c0_i32_0, %c0_i32_1 : i32, i32, i32
  }
  func.func @transform_4(%arg0: i32) -> (i32, i32) {
    %c0_i32 = arith.constant 0 : i32
    %c0_i32_0 = arith.constant 0 : i32
    %c0_i32_1 = arith.constant 0 : i32
    return %c0_i32, %c0_i32_0 : i32, i32
  }
  func.func @transform_5(%arg0: i32) -> (i32, i32, i32) {
    %c0_i32 = arith.constant 0 : i32
    %c0_i32_0 = arith.constant 0 : i32
    %c0_i32_1 = arith.constant 0 : i32
    %c0_i32_2 = arith.constant 0 : i32
    return %c0_i32, %c0_i32_0, %c0_i32_1 : i32, i32, i32
  }
  func.func @transform_6(%arg0: i32) -> (i32, i32, i32) {
    %c0_i32 = arith.constant 0 : i32
    %c0_i32_0 = arith.constant 0 : i32
    %c0_i32_1 = arith.constant 0 : i32
    %c0_i32_2 = arith.constant 0 : i32
    return %c0_i32, %c0_i32_0, %c0_i32_1 : i32, i32, i32
  }
  func.func @transform_7(%arg0: i32) -> (i32, i32) {
    %c0_i32 = arith.constant 0 : i32
    %c0_i32_0 = arith.constant 0 : i32
    %c0_i32_1 = arith.constant 0 : i32
    return %c0_i32, %c0_i32_0 : i32, i32
  }
  func.func @transform_8(%arg0: i32) -> (i32, i32) {
    %c0_i32 = arith.constant 0 : i32
    %c0_i32_0 = arith.constant 0 : i32
    %c0_i32_1 = arith.constant 0 : i32
    return %c0_i32, %c0_i32_0 : i32, i32
  }
  func.func @transform_9(%arg0: i32) -> (i32, i32, i32) {
    %c0_i32 = arith.constant 0 : i32
    %c0_i32_0 = arith.constant 0 : i32
    %c0_i32_1 = arith.constant 0 : i32
    return %arg0, %c0_i32, %c0_i32_0 : i32, i32, i32
  }
}

</mosaic_0001>

<bundles_post_ra>
// kernel: _lambda_.1
= control target key start
LH: loop header
LB: loop body
LE: loop exit
PB: predicated region body
PF: predicated region fallthrough
CT: control target
= control target key end

     0   :  { %s2790_s30 = smov 0   ;;  %s3256_s0 = inlined_call_operand.vmem [shape: bf16[2,128,128], index: 0, kind: input, shape index: {}]   ;;  %s3257_s1 = inlined_call_operand.vmem [shape: bf16[2,128,128], index: 1, kind: input, shape index: {}]   ;;  %s3258_s2 = inlined_call_operand.vmem [shape: f32[2,128,1], index: 2, kind: input, shape index: {}]   ;;  %s3259_s3 = inlined_call_operand.vmem [shape: bf16[2,128,128], index: 3, kind: input, shape index: {}]   ;;  %s3260_s4 = inlined_call_operand.vmem [shape: f32[1,128], index: 4, kind: input, shape index: {}]   ;;  %s3261_s5 = inlined_call_operand.vmem [shape: bf16[2,256,128], index: 5, kind: input, shape index: {}]   ;;  %s3262_s6 = inlined_call_operand.vmem [shape: f32[2,1,128], index: 6, kind: input, shape index: {}]   ;;  %s3263_s7 = inlined_call_operand.vmem [shape: f32[128,128], index: 7, kind: input, shape index: {}]   ;;  %s3264_s8 = inlined_call_operand.vmem [shape: f32[1,128], index: 8, kind: input, shape index: {}]   ;;  %s3265_s9 = inlined_call_operand.vmem [shape: f32[2,8,128], index: 9, kind: output, shape index: {}]  }
   0x1 LB: > { %s2057_s10 = sadd.s32 4294967295, %s2734_s30   ;;  %p2061_p0 = scmp.ge.s32.totalorder %s2734_s30, 1  ;;  %s2734_s30 = sphi %s2790_s30, %s19_s30  }
   0x2   : > { %p307_p1 = scmp.lt.s32.totalorder %s2734_s30, 3 }
   0x4   : > { %p308_p2 = pnand %p2061_p0, %p307_p1 }
   0x5   : > { %p352_p3 = scmp.lt.s32.totalorder (!%p308_p2), %s2057_s10, 1  ;;  %v2680_v0 = vld [vmem:[%s3259_s3 + $0x40] sm:$0xff] (!%p308_p2)   ;;  %v2681_v1 = vld [vmem:[%s3259_s3 + $0x48] sm:$0xff] (!%p308_p2)   ;;  %v2682_v2 = vld [vmem:[%s3259_s3 + $0x50] sm:$0xff] (!%p308_p2)   ;;  %vm2738_vm0 = vmmov (!%p308_p2), 0  }
   0x6   : > { %311 = sbr.rel (%p308_p2) target bundleno = 1779 (0x6f3), region = 56  ;;  %2447 = vmatprep.subr.bf16.mxu1 (!%p308_p2), %v2680_v0  ;;  %v2683_v5 = vld [vmem:[%s3259_s3 + $0x58] sm:$0xff] (!%p308_p2)   ;;  %v2684_v7 = vld [vmem:[%s3259_s3 + $0x60] sm:$0xff] (!%p308_p2)   ;;  %v2685_v10 = vld [vmem:[%s3259_s3 + $0x68] sm:$0xff] (!%p308_p2)  }
   0x7   : > { %2448 = vmatpush3.bf16.msra.mxu1 (!%p308_p2), %v2680_v0  ;;  %v2686_v13 = vld [vmem:[%s3259_s3 + $0x70] sm:$0xff] (!%p308_p2)   ;;  %v2687_v23 = vld [vmem:[%s3259_s3 + $0x78] sm:$0xff] (!%p308_p2)   ;;  %v2688_v24 = vld [vmem:[%s3259_s3] sm:$0xff] (!%p308_p2)  }
   0x8   : > { %2449 = vmatprep.subr.bf16.mxu1 (!%p308_p2), %v2681_v1  ;;  %v2689_v31 = vld [vmem:[%s3259_s3 + $0x8] sm:$0xff] (!%p308_p2)   ;;  %v2690_v34 = vld [vmem:[%s3259_s3 + $0x10] sm:$0xff] (!%p308_p2)   ;;  %v2691_v39 = vld [vmem:[%s3259_s3 + $0x18] sm:$0xff] (!%p308_p2)  }
   0x9   : > { %v2692_v42 = vld [vmem:[%s3259_s3 + $0x20] sm:$0xff] (!%p308_p2)   ;;  %v2693_v47 = vld [vmem:[%s3259_s3 + $0x28] sm:$0xff] (!%p308_p2)   ;;  %v2694_v50 = vld [vmem:[%s3259_s3 + $0x30] sm:$0xff] (!%p308_p2)  }
   0xa   : > { %v2695_v55 = vld [vmem:[%s3259_s3 + $0x38] sm:$0xff] (!%p308_p2)   ;;  %v2117_v56 = vld [vmem:[%s3260_s4] ss:$0 sm:$0xff] (!%p308_p2) }
   0xb   : > { %2450 = vmatpush3.bf16.msra.mxu1 (!%p308_p2), %v2681_v1 }
   0xc   : > { %2451 = vmatprep.subr.bf16.mxu1 (!%p308_p2), %v2682_v2 }
   0xd   : > { %s3267_s10 = smov (!%p352_p3, %s2057_s10), 1 }
   0xe   : > { %s2187_s15 = sshll.u32 %s3267_s10, 6  ;;  %s2189_s23 = sshll.u32 %s3267_s10, 7 }
   0xf   : > { %s2813_s20 = scalar_lea.vmem %s3257_s1, %s2187_s15  ;;  %s2833_s25 = scalar_lea.vmem %s3256_s0, %s2187_s15  ;;  %2452 = vmatpush3.bf16.msra.mxu1 %v2682_v2 }
  0x10   : > { %v2816_v3 = vld [vmem:[%s2813_s20] sm:$0xff]   ;;  %v2819_v4 = vld [vmem:[%s2813_s20 + $0x8] sm:$0xff]   ;;  %v2828_v6 = vld [vmem:[%s2813_s20 + $0x10] sm:$0xff]   ;;  %2453 = vmatprep.subr.bf16.mxu1 %v2683_v5  ;;  %s3151_s26 = scalar_lea.vmem %s3258_s2, %s2189_s23 }
  0x11   : > { %2415 = vmatprep.subr.bf16.mxu0 %v2816_v3  ;;  %v2840_v8 = vld [vmem:[%s2813_s20 + $0x18] sm:$0xff]   ;;  %v2844_v9 = vld [vmem:[%s2833_s25] sm:$0xff]   ;;  %v2857_v12 = vld [vmem:[%s2813_s20 + $0x28] sm:$0xff]  }
  0x12   : > { %2416 = vmatpush3.bf16.msra.mxu0 %v2816_v3  ;;  %2431 = vmatprep.mubr.bf16.mxu0 %v2844_v9  ;;  %v2853_v11 = vld [vmem:[%s2813_s20 + $0x20] sm:$0xff]   ;;  %v2864_v14 = vld [vmem:[%s2813_s20 + $0x30] sm:$0xff]   ;;  %v2869_v15 = vld [vmem:[%s2813_s20 + $0x38] sm:$0xff]  }
  0x13   : > { %2417 = vmatprep.subr.bf16.mxu0 %v2819_v4  ;;  %2454 = vmatpush3.bf16.msra.mxu1 %v2683_v5  ;;  %v2876_v16 = vld [vmem:[%s2833_s25 + $0x8] sm:$0xff]   ;;  %v2879_v17 = vld [vmem:[%s2833_s25 + $0x10] sm:$0xff]   ;;  %v2885_v18 = vld [vmem:[%s2833_s25 + $0x18] sm:$0xff]  }
  0x14   : > { %2455 = vmatprep.subr.bf16.mxu1 %v2684_v7  ;;  %v2888_v19 = vld [vmem:[%s2833_s25 + $0x20] sm:$0xff]   ;;  %v2893_v20 = vld [vmem:[%s2833_s25 + $0x28] sm:$0xff]   ;;  %v2896_v21 = vld [vmem:[%s2833_s25 + $0x30] sm:$0xff]  }
  0x15   : > { %v2901_v22 = vld [vmem:[%s2833_s25 + $0x38] sm:$0xff]   ;;  %s2068_s25 = sshll.u32 %s3267_s10, 3 }
  0x16   : > { %2418 = vmatpush3.bf16.msra.mxu0 %v2819_v4  ;;  %s370_s28 = scalar_lea.vmem %s3265_s9, %s2068_s25 }
  0x17   : > { %2419 = vmatprep.subr.bf16.mxu0 %v2828_v6  ;;  %2456 = vmatpush3.bf16.msra.mxu1 %v2684_v7 }
  0x18   : > { %2457 = vmatprep.subr.bf16.mxu1 %v2685_v10 }
  0x1a   : > { %2420 = vmatpush3.bf16.msra.mxu0 %v2828_v6 }
  0x1b   : > { %2421 = vmatprep.subr.bf16.mxu0 %v2840_v8  ;;  %2458 = vmatpush3.bf16.msra.mxu1 %v2685_v10 }
  0x1c   : > { %2459 = vmatprep.subr.bf16.mxu1 %v2686_v13 }
  0x1e   : > { %2422 = vmatpush3.bf16.msra.mxu0 %v2840_v8 }
  0x1f   : > { %2423 = vmatprep.subr.bf16.mxu0 %v2853_v11  ;;  %2460 = vmatpush3.bf16.msra.mxu1 %v2686_v13 }
  0x20   : > { %2461 = vmatprep.subr.bf16.mxu1 %v2687_v23 }
  0x22   : > { %2424 = vmatpush3.bf16.msra.mxu0 %v2853_v11 }
  0x23   : > { %2425 = vmatprep.subr.bf16.mxu0 %v2857_v12  ;;  %2462 = vmatpush3.bf16.msra.mxu1 %v2687_v23 }
  0x24   : > { %2479 = vmatprep.subr.bf16.mxu1 %v2688_v24 }
  0x26   : > { %2426 = vmatpush3.bf16.msra.mxu0 %v2857_v12 }
  0x27   : > { %2427 = vmatprep.subr.bf16.mxu0 %v2864_v14 }
  0x2a   : > { %2428 = vmatpush3.bf16.msra.mxu0 %v2864_v14 }
  0x2b   : > { %2429 = vmatprep.subr.bf16.mxu0 %v2869_v15 }
  0x2e   : > { %2430 = vmatpush3.bf16.msra.mxu0 %v2869_v15 }
  0x31   : > { %2432 = vmatmul.mubr.bf16.vlgmr.msra.gmra.mrb[0].mxu0 %v2876_v16 }
  0x32   : > { %2435 = vmatprep.mubr.bf16.mxu0 %v2879_v17 }
  0x39   : > { %2436 = vmatmul.mubr.bf16.gmra.mrb[4].mxu0 %v2885_v18 }
  0x3a   : > { %2439 = vmatprep.mubr.bf16.mxu0 %v2888_v19 }
  0x41   : > { %2440 = vmatmul.mubr.bf16.gmra.mrb[8].mxu0 %v2893_v20 }
  0x42   : > { %2443 = vmatprep.mubr.bf16.mxu0 %v2896_v21 }
  0x49   : > { %2444 = vmatmul.mubr.bf16.gmra.mrb[12].mxu0 %v2901_v22 }
  0x4a   : > { %2527 = vmatprep.mubr.bf16.mxu0 %v2844_v9 }
 0x104   : > { %v2433_v25 = vpop.f32.mrb[0].mxu0 }
 0x105   : > { %v534_v26 = vpop.f32.mrb[1].mxu0 }
 0x106   : > { %v2434_v27 = vpop.f32.mrb[2].mxu0 }
 0x107   : > { %v598_v28 = vpack.c.bf16 %v2434_v27, %v2433_v25  ;;  %v537_v29 = vpop.f32.mrb[3].mxu0 }
 0x108   : > { %v597_v30 = vpack.c.bf16 %v537_v29, %v534_v26 }
 0x10a   : > { %2463 = vmatprep.mubr.bf16.mxu1 %v597_v30 }
 0x10b   : > { %2464 = vmatmul.mubr.bf16.vlgmr.msra.gmra.mrb[0].mxu1 %v598_v28 }
 0x10c   : > { %v2437_v32 = vpop.f32.mrb[4].mxu0  ;;  %2480 = vmatpush3.bf16.msra.mxu1 %v2688_v24 }
 0x10d   : > { %v550_v33 = vpop.f32.mrb[5].mxu0  ;;  %2481 = vmatprep.subr.bf16.mxu1 %v2689_v31 }
 0x10e   : > { %v2438_v35 = vpop.f32.mrb[6].mxu0 }
 0x10f   : > { %v600_v36 = vpack.c.bf16 %v2438_v35, %v2437_v32  ;;  %v553_v37 = vpop.f32.mrb[7].mxu0 }
 0x110   : > { %v599_v38 = vpack.c.bf16 %v553_v37, %v550_v33  ;;  %2482 = vmatpush3.bf16.msra.mxu1 %v2689_v31 }
 0x111   : > { %2483 = vmatprep.subr.bf16.mxu1 %v2690_v34 }
 0x112   : > { %2467 = vmatprep.mubr.bf16.mxu1 %v599_v38 }
 0x113   : > { %2468 = vmatmul.mubr.bf16.gmra.mrb[4].mxu1 %v600_v36 }
 0x114   : > { %v2441_v40 = vpop.f32.mrb[8].mxu0  ;;  %2484 = vmatpush3.bf16.msra.mxu1 %v2690_v34 }
 0x115   : > { %v566_v41 = vpop.f32.mrb[9].mxu0  ;;  %2485 = vmatprep.subr.bf16.mxu1 %v2691_v39 }
 0x116   : > { %v2442_v43 = vpop.f32.mrb[10].mxu0 }
 0x117   : > { %v602_v44 = vpack.c.bf16 %v2442_v43, %v2441_v40  ;;  %v569_v45 = vpop.f32.mrb[11].mxu0 }
 0x118   : > { %v601_v46 = vpack.c.bf16 %v569_v45, %v566_v41  ;;  %2486 = vmatpush3.bf16.msra.mxu1 %v2691_v39 }
 0x119   : > { %2487 = vmatprep.subr.bf16.mxu1 %v2692_v42 }
 0x11a   : > { %2471 = vmatprep.mubr.bf16.mxu1 %v601_v46 }
 0x11b   : > { %2472 = vmatmul.mubr.bf16.gmra.mrb[8].mxu1 %v602_v44 }
 0x11c   : > { %v2445_v48 = vpop.f32.mrb[12].mxu0  ;;  %2488 = vmatpush3.bf16.msra.mxu1 %v2692_v42 }
 0x11d   : > { %v582_v49 = vpop.f32.mrb[13].mxu0  ;;  %2489 = vmatprep.subr.bf16.mxu1 %v2693_v47 }
 0x11e   : > { %v2446_v51 = vpop.f32.mrb[14].mxu0 }
 0x11f   : > { %v604_v52 = vpack.c.bf16 %v2446_v51, %v2445_v48  ;;  %v585_v53 = vpop.f32.mrb[15].mxu0 }
 0x120   : > { %v603_v54 = vpack.c.bf16 %v585_v53, %v582_v49  ;;  %2490 = vmatpush3.bf16.msra.mxu1 %v2693_v47 }
 0x121   : > { %2491 = vmatprep.subr.bf16.mxu1 %v2694_v50 }
 0x122   : > { %2475 = vmatprep.mubr.bf16.mxu1 %v603_v54 }
 0x123   : > { %2476 = vmatmul.mubr.bf16.gmra.mrb[12].mxu1 %v604_v52 }
 0x124   : > { %2492 = vmatpush3.bf16.msra.mxu1 %v2694_v50  ;;  %2495 = vmatprep.mubr.bf16.mxu1 %v2816_v3 }
 0x125   : > { %2493 = vmatprep.subr.bf16.mxu1 %v2695_v55 }
 0x128   : > { %2494 = vmatpush3.bf16.msra.mxu1 %v2695_v55 }
 0x12b   : > { %2496 = vmatmul.mubr.bf16.vlgmr.msra.gmra.mrb[0].mxu1 %v2819_v4 }
 0x12c   : > { %2499 = vmatprep.mubr.bf16.mxu1 %v2828_v6 }
 0x133   : > { %2500 = vmatmul.mubr.bf16.gmra.mrb[4].mxu1 %v2840_v8 }
 0x134   : > { %2503 = vmatprep.mubr.bf16.mxu1 %v2853_v11 }
 0x13b   : > { %2504 = vmatmul.mubr.bf16.gmra.mrb[8].mxu1 %v2857_v12 }
 0x13c   : > { %2507 = vmatprep.mubr.bf16.mxu1 %v2864_v14 }
 0x143   : > { %2508 = vmatmul.mubr.bf16.gmra.mrb[12].mxu1 %v2869_v15 }
 0x144   : > { %2559 = vmatprep.mubr.bf16.mxu1 %v2844_v9 }
 0x1fe   : > { %v2497_v57 = vpop.f32.mrb[0].mxu1 }
 0x1ff   : > { %v937_v58 = vadd.f32 %v2497_v57, %v2117_v56  ;;  %v865_v59 = vpop.f32.mrb[1].mxu1  ;;  %v2697_v57 = vld [vmem:[%s3261_s5] sm:$0xff]  }
 0x200   : > { %v935_v60 = vadd.f32 %v2117_v56, %v865_v59  ;;  %v2498_v61 = vpop.f32.mrb[2].mxu1  ;;  %v2699_v59 = vld [vmem:[%s3261_s5 + $0x8] sm:$0xff]  }
 0x201   : > { %v938_v62 = vadd.f32 %v2498_v61, %v2117_v56  ;;  %v868_v63 = vpop.f32.mrb[3].mxu1  ;;  %v953_v1 = vmax.f32 %v937_v58, 0.0  ;;  %v2698_v58 = vld [vmem:[%s3261_s5 + $0x48] sm:$0xff]   ;;  %v2701_v61 = vld [vmem:[%s3261_s5 + $0x10] sm:$0xff]  }
 0x202   : > { %v936_v0 = vadd.f32 %v2117_v56, %v868_v63  ;;  %v951_v3 = vmax.f32 %v935_v60, 0.0  ;;  %v2700_v60 = vld [vmem:[%s3261_s5 + $0x50] sm:$0xff]   ;;  %v2703_v63 = vld [vmem:[%s3261_s5 + $0x18] sm:$0xff]  }
 0x203   : > { %v954_v2 = vmax.f32 %v938_v62, 0.0  ;;  %v2702_v62 = vld [vmem:[%s3261_s5 + $0x58] sm:$0xff]  }
 0x204   : > { %v952_v4 = vmax.f32 %v936_v0, 0.0  ;;  %v2704_v0 = vld [vmem:[%s3261_s5 + $0x60] sm:$0xff]  }
 0x205   : > { %v2944_v5 = vpack.c.bf16 %v954_v2, %v953_v1  ;;  %v2705_v1 = vld [vmem:[%s3261_s5 + $0x20] sm:$0xff]   ;;  %v2706_v2 = vld [vmem:[%s3261_s5 + $0x68] sm:$0xff]  }
 0x206   : > { %v2946_v6 = vpack.c.bf16 %v952_v4, %v951_v3  ;;  %v2501_v7 = vpop.f32.mrb[4].mxu1  ;;  %v2707_v3 = vld [vmem:[%s3261_s5 + $0x28] sm:$0xff]   ;;  %v2708_v4 = vld [vmem:[%s3261_s5 + $0x70] sm:$0xff]  }
 0x207   : > { %v941_v8 = vadd.f32 %v2501_v7, %v2117_v56  ;;  %v881_v9 = vpop.f32.mrb[5].mxu1  ;;  %v2709_v7 = vld [vmem:[%s3261_s5 + $0x30] sm:$0xff]  }
 0x208   : > { %v939_v10 = vadd.f32 %v2117_v56, %v881_v9  ;;  %v2502_v11 = vpop.f32.mrb[6].mxu1  ;;  %2511 = vmatprep.subr.bf16.mxu0 %v2946_v6  ;;  %v2711_v9 = vld [vmem:[%s3261_s5 + $0x38] sm:$0xff]  }
 0x209   : > { %v942_v12 = vadd.f32 %v2502_v11, %v2117_v56  ;;  %v884_v13 = vpop.f32.mrb[7].mxu1  ;;  %2512 = vmatpush3.bf16.msra.mxu0 %v2946_v6  ;;  %v957_v15 = vmax.f32 %v941_v8, 0.0  ;;  %v2710_v8 = vld [vmem:[%s3261_s5 + $0x78] sm:$0xff]  }
 0x20a   : > { %v940_v14 = vadd.f32 %v2117_v56, %v884_v13  ;;  %2513 = vmatprep.subr.bf16.mxu0 %v2944_v5  ;;  %v955_v24 = vmax.f32 %v939_v10, 0.0 }
 0x20b   : > { %v958_v23 = vmax.f32 %v942_v12, 0.0 }
 0x20c   : > { %v956_v25 = vmax.f32 %v940_v14, 0.0 }
 0x20d   : > { %v2951_v26 = vpack.c.bf16 %v958_v23, %v957_v15  ;;  %2514 = vmatpush3.bf16.msra.mxu0 %v2944_v5 }
 0x20e   : > { %v2954_v27 = vpack.c.bf16 %v956_v25, %v955_v24  ;;  %v2505_v28 = vpop.f32.mrb[8].mxu1 }
 0x20f   : > { %v945_v29 = vadd.f32 %v2505_v28, %v2117_v56  ;;  %v897_v30 = vpop.f32.mrb[9].mxu1 }
 0x210   : > { %v943_v31 = vadd.f32 %v2117_v56, %v897_v30  ;;  %v2506_v32 = vpop.f32.mrb[10].mxu1  ;;  %2515 = vmatprep.subr.bf16.mxu0 %v2954_v27 }
 0x211   : > { %v946_v33 = vadd.f32 %v2506_v32, %v2117_v56  ;;  %v900_v34 = vpop.f32.mrb[11].mxu1  ;;  %2516 = vmatpush3.bf16.msra.mxu0 %v2954_v27  ;;  %v961_v36 = vmax.f32 %v945_v29, 0.0 }
 0x212   : > { %v944_v35 = vadd.f32 %v2117_v56, %v900_v34  ;;  %2517 = vmatprep.subr.bf16.mxu0 %v2951_v26  ;;  %v959_v38 = vmax.f32 %v943_v31, 0.0 }
 0x213   : > { %v962_v37 = vmax.f32 %v946_v33, 0.0 }
 0x214   : > { %v960_v39 = vmax.f32 %v944_v35, 0.0 }
 0x215   : > { %v2959_v40 = vpack.c.bf16 %v962_v37, %v961_v36  ;;  %2518 = vmatpush3.bf16.msra.mxu0 %v2951_v26 }
 0x216   : > { %v2962_v41 = vpack.c.bf16 %v960_v39, %v959_v38  ;;  %v2509_v42 = vpop.f32.mrb[12].mxu1 }
 0x217   : > { %v949_v43 = vadd.f32 %v2509_v42, %v2117_v56  ;;  %v913_v44 = vpop.f32.mrb[13].mxu1 }
 0x218   : > { %v947_v45 = vadd.f32 %v2117_v56, %v913_v44  ;;  %v2510_v46 = vpop.f32.mrb[14].mxu1  ;;  %2519 = vmatprep.subr.bf16.mxu0 %v2962_v41 }
 0x219   : > { %v950_v47 = vadd.f32 %v2510_v46, %v2117_v56  ;;  %v916_v48 = vpop.f32.mrb[15].mxu1  ;;  %2520 = vmatpush3.bf16.msra.mxu0 %v2962_v41  ;;  %v965_v50 = vmax.f32 %v949_v43, 0.0 }
 0x21a   : > { %v948_v49 = vadd.f32 %v2117_v56, %v916_v48  ;;  %2521 = vmatprep.subr.bf16.mxu0 %v2959_v40  ;;  %v963_v52 = vmax.f32 %v947_v45, 0.0  ;;  %v2696_v56 = vld [vmem:[%s3261_s5 + $0x40] sm:$0xff]  }
 0x21b   : > { %v966_v51 = vmax.f32 %v950_v47, 0.0 }
 0x21c   : > { %v964_v53 = vmax.f32 %v948_v49, 0.0 }
 0x21d   : > { %v2967_v54 = vpack.c.bf16 %v966_v51, %v965_v50  ;;  %2522 = vmatpush3.bf16.msra.mxu0 %v2959_v40 }
 0x21e   : > { %v2970_v55 = vpack.c.bf16 %v964_v53, %v963_v52 }
 0x220   : > { %2523 = vmatprep.subr.bf16.mxu0 %v2970_v55 }
 0x221   : > { %2524 = vmatpush3.bf16.msra.mxu0 %v2970_v55 }
 0x222   : > { %2525 = vmatprep.subr.bf16.mxu0 %v2967_v54 }
 0x225   : > { %2526 = vmatpush3.bf16.msra.mxu0 %v2967_v54 }
 0x226   : > { %2254 = vmatprep.subr.bf16.mxu0 %v2696_v56 }
 0x228   : > { %2528 = vmatmul.mubr.bf16.vlgmr.msra.gmra.mrb[16].mxu0 %v2876_v16 }
 0x229   : > { %2531 = vmatprep.mubr.bf16.mxu0 %v2879_v17  ;;  %2255 = vmatpush3.bf16.msra.mxu0 %v2697_v57 }
 0x22a   : > { %2256 = vmatprep.subr.bf16.mxu0 %v2698_v58 }
 0x22d   : > { %2257 = vmatpush3.bf16.msra.mxu0 %v2699_v59 }
 0x22e   : > { %2258 = vmatprep.subr.bf16.mxu0 %v2700_v60 }
 0x230   : > { %2532 = vmatmul.mubr.bf16.gmra.mrb[20].mxu0 %v2885_v18 }
 0x231   : > { %2535 = vmatprep.mubr.bf16.mxu0 %v2888_v19  ;;  %2259 = vmatpush3.bf16.msra.mxu0 %v2701_v61 }
 0x232   : > { %2260 = vmatprep.subr.bf16.mxu0 %v2702_v62 }
 0x235   : > { %2261 = vmatpush3.bf16.msra.mxu0 %v2703_v63 }
 0x236   : > { %2262 = vmatprep.subr.bf16.mxu0 %v2704_v0 }
 0x238   : > { %2536 = vmatmul.mubr.bf16.gmra.mrb[24].mxu0 %v2893_v20 }
 0x239   : > { %2539 = vmatprep.mubr.bf16.mxu0 %v2896_v21  ;;  %2263 = vmatpush3.bf16.msra.mxu0 %v2705_v1 }
 0x23a   : > { %2264 = vmatprep.subr.bf16.mxu0 %v2706_v2 }
 0x23d   : > { %2265 = vmatpush3.bf16.msra.mxu0 %v2707_v3 }
 0x23e   : > { %2266 = vmatprep.subr.bf16.mxu0 %v2708_v4 }
 0x240   : > { %2540 = vmatmul.mubr.bf16.gmra.mrb[28].mxu0 %v2901_v22 }
 0x241   : > { %2267 = vmatpush3.bf16.msra.mxu0 %v2709_v7 }
 0x242   : > { %2268 = vmatprep.subr.bf16.mxu0 %v2710_v8 }
 0x245   : > { %2269 = vmatpush3.bf16.msra.mxu0 %v2711_v9 }
 0x2fb   : > { %v2529_v10 = vpop.f32.mrb[16].mxu0 }
 0x2fc   : > { %v1025_v11 = vpop.f32.mrb[17].mxu0 }
 0x2fd   : > { %v2530_v12 = vpop.f32.mrb[18].mxu0 }
 0x2fe   : > { %v1089_v13 = vpack.c.bf16 %v2530_v12, %v2529_v10  ;;  %v1028_v14 = vpop.f32.mrb[19].mxu0 }
 0x2ff   : > { %v1088_v15 = vpack.c.bf16 %v1028_v14, %v1025_v11 }
 0x301   : > { %1287 = vmatprep.mubr.bf16.mxu0 %v1088_v15 }
 0x302   : > { %1288 = vmatmul.mubr.bf16.vlgmr.msra.gmra.mrb[32].mxu0 %v2946_v6 }
 0x303   : > { %1295 = vmatprep.mubr.bf16.mxu0 %v1089_v13  ;;  %v2533_v23 = vpop.f32.mrb[20].mxu0 }
 0x304   : > { %v1041_v24 = vpop.f32.mrb[21].mxu0 }
 0x305   : > { %v2534_v25 = vpop.f32.mrb[22].mxu0 }
 0x306   : > { %v1091_v28 = vpack.c.bf16 %v2534_v25, %v2533_v23  ;;  %v1044_v29 = vpop.f32.mrb[23].mxu0 }
 0x307   : > { %v1090_v30 = vpack.c.bf16 %v1044_v29, %v1041_v24 }
 0x30a   : > { %1296 = vmatmul.mubr.bf16.gmra.mrb[36].mxu0 %v2944_v5 }
 0x30b   : > { %1303 = vmatprep.mubr.bf16.mxu0 %v1090_v30  ;;  %v2537_v31 = vpop.f32.mrb[24].mxu0 }
 0x30c   : > { %v1057_v32 = vpop.f32.mrb[25].mxu0 }
 0x30d   : > { %v2538_v33 = vpop.f32.mrb[26].mxu0 }
 0x30e   : > { %v1093_v34 = vpack.c.bf16 %v2538_v33, %v2537_v31  ;;  %v1060_v35 = vpop.f32.mrb[27].mxu0 }
 0x30f   : > { %v1092_v36 = vpack.c.bf16 %v1060_v35, %v1057_v32 }
 0x312   : > { %1304 = vmatmul.mubr.bf16.gmra.mrb[40].mxu0 %v2954_v27  ;;  %v3042_v27 = vld [vmem:[%s3262_s6] ss:$0 sm:$0xff] }
 0x313   : > { %1311 = vmatprep.mubr.bf16.mxu0 %v1091_v28  ;;  %v2541_v6 = vpop.f32.mrb[28].mxu0 }
 0x314   : > { %v1073_v37 = vpop.f32.mrb[29].mxu0 }
 0x315   : > { %v2542_v38 = vpop.f32.mrb[30].mxu0 }
 0x316   : > { %v1095_v39 = vpack.c.bf16 %v2542_v38, %v2541_v6  ;;  %v1076_v42 = vpop.f32.mrb[31].mxu0 }
 0x317   : > { %v1094_v43 = vpack.c.bf16 %v1076_v42, %v1073_v37 }
 0x31a   : > { %1312 = vmatmul.mubr.bf16.gmra.mrb[44].mxu0 %v2951_v26 }
 0x31b   : > { %1319 = vmatprep.mubr.bf16.mxu0 %v1092_v36 }
 0x322   : > { %1320 = vmatmul.mubr.bf16.gmra.mrb[48].mxu0 %v2962_v41 }
 0x323   : > { %1327 = vmatprep.mubr.bf16.mxu0 %v1093_v34 }
 0x32a   : > { %1328 = vmatmul.mubr.bf16.gmra.mrb[52].mxu0 %v2959_v40 }
 0x32b   : > { %1335 = vmatprep.mubr.bf16.mxu0 %v1094_v43 }
 0x332   : > { %1336 = vmatmul.mubr.bf16.gmra.mrb[56].mxu0 %v2970_v55 }
 0x333   : > { %1343 = vmatprep.mubr.bf16.mxu0 %v1095_v39 }
 0x33a   : > { %1344 = vmatmul.mubr.bf16.gmra.mrb[60].mxu0 %v2967_v54 }
 0x3d5   : > { %v2270_v5 = vpop.f32.mrb[32].mxu0 }
 0x3d6   : > { %v2271_v44 = vpop.f32.mrb[33].mxu0 }
 0x3d7   : > { %v2272_v26 = vadd.f32 %v2271_v44, %v2270_v5  ;;  %v2273_v45 = vpop.f32.mrb[34].mxu0 }
 0x3d8   : > { %v2274_v46 = vpop.f32.mrb[35].mxu0 }
 0x3d9   : > { %v1290_v41 = vadd.f32 %v2272_v26, %v3042_v27  ;;  %v2275_v47 = vadd.f32 %v2274_v46, %v2273_v45 }
 0x3db   : > { %v1293_v40 = vadd.f32 %v2275_v47, %v3042_v27  ;;  %v1352_v48 = vmax.f32 %v1290_v41, 0.0 }
 0x3dd   : > { %v1353_v49 = vmax.f32 %v1293_v40, 0.0  ;;  %v2276_v50 = vpop.f32.mrb[36].mxu0 }
 0x3de   : > { %v2277_v51 = vpop.f32.mrb[37].mxu0 }
 0x3df   : > { %v2278_v52 = vadd.f32 %v2277_v51, %v2276_v50  ;;  %v2279_v53 = vpop.f32.mrb[38].mxu0  ;;  %v3046_v54 = vpack.c.bf16 %v1353_v49, %v1352_v48 }
 0x3e0   : > { %v2280_v55 = vpop.f32.mrb[39].mxu0 }
 0x3e1   : > { %v1298_v56 = vadd.f32 %v2278_v52, %v3042_v27  ;;  %v2281_v57 = vadd.f32 %v2280_v55, %v2279_v53  ;;  %2543 = vmatprep.subr.bf16.mxu1 %v3046_v54 }
 0x3e2   : > { %2544 = vmatpush3.bf16.msra.mxu1 %v3046_v54 }
 0x3e3   : > { %v1301_v58 = vadd.f32 %v2281_v57, %v3042_v27  ;;  %v1354_v59 = vmax.f32 %v1298_v56, 0.0 }
 0x3e5   : > { %v1355_v60 = vmax.f32 %v1301_v58, 0.0  ;;  %v2282_v61 = vpop.f32.mrb[40].mxu0 }
 0x3e6   : > { %v2283_v62 = vpop.f32.mrb[41].mxu0 }
 0x3e7   : > { %v2284_v63 = vadd.f32 %v2283_v62, %v2282_v61  ;;  %v2285_v0 = vpop.f32.mrb[42].mxu0  ;;  %v3052_v1 = vpack.c.bf16 %v1355_v60, %v1354_v59 }
 0x3e8   : > { %v2286_v2 = vpop.f32.mrb[43].mxu0 }
 0x3e9   : > { %v1306_v3 = vadd.f32 %v2284_v63, %v3042_v27  ;;  %v2287_v4 = vadd.f32 %v2286_v2, %v2285_v0  ;;  %2545 = vmatprep.subr.bf16.mxu1 %v3052_v1 }
 0x3ea   : > { %2546 = vmatpush3.bf16.msra.mxu1 %v3052_v1 }
 0x3eb   : > { %v1309_v7 = vadd.f32 %v2287_v4, %v3042_v27  ;;  %v1356_v8 = vmax.f32 %v1306_v3, 0.0 }
 0x3ed   : > { %v1357_v9 = vmax.f32 %v1309_v7, 0.0  ;;  %v2288_v10 = vpop.f32.mrb[44].mxu0 }
 0x3ee   : > { %v2289_v11 = vpop.f32.mrb[45].mxu0 }
 0x3ef   : > { %v2290_v12 = vadd.f32 %v2289_v11, %v2288_v10  ;;  %v2291_v13 = vpop.f32.mrb[46].mxu0  ;;  %v3058_v14 = vpack.c.bf16 %v1357_v9, %v1356_v8 }
 0x3f0   : > { %v2292_v15 = vpop.f32.mrb[47].mxu0 }
 0x3f1   : > { %v1314_v23 = vadd.f32 %v2290_v12, %v3042_v27  ;;  %v2293_v24 = vadd.f32 %v2292_v15, %v2291_v13  ;;  %2547 = vmatprep.subr.bf16.mxu1 %v3058_v14  ;;  %v2712_v12 = vld [vmem:[%s3261_s5 + $0xc0] sm:$0xff]   ;;  %v2715_v15 = vld [vmem:[%s3261_s5 + $0x88] sm:$0xff]  }
 0x3f2   : > { %2548 = vmatpush3.bf16.msra.mxu1 %v3058_v14  ;;  %v2713_v13 = vld [vmem:[%s3261_s5 + $0x80] sm:$0xff]  }
 0x3f3   : > { %v1317_v25 = vadd.f32 %v2293_v24, %v3042_v27  ;;  %v1358_v28 = vmax.f32 %v1314_v23, 0.0  ;;  %v2716_v23 = vld [vmem:[%s3261_s5 + $0xd0] sm:$0xff]  }
 0x3f4   : > { %v2717_v24 = vld [vmem:[%s3261_s5 + $0x90] sm:$0xff]  }
 0x3f5   : > { %v1359_v29 = vmax.f32 %v1317_v25, 0.0  ;;  %v2294_v30 = vpop.f32.mrb[48].mxu0  ;;  %v2720_v25 = vld [vmem:[%s3261_s5 + $0xe0] sm:$0xff]  }
 0x3f6   : > { %v2295_v31 = vpop.f32.mrb[49].mxu0 }
 0x3f7   : > { %v2296_v32 = vadd.f32 %v2295_v31, %v2294_v30  ;;  %v2297_v33 = vpop.f32.mrb[50].mxu0  ;;  %v3064_v34 = vpack.c.bf16 %v1359_v29, %v1358_v28  ;;  %v2721_v28 = vld [vmem:[%s3261_s5 + $0xa0] sm:$0xff]   ;;  %v2724_v29 = vld [vmem:[%s3261_s5 + $0xf0] sm:$0xff]   ;;  %v2727_v30 = vld [vmem:[%s3261_s5 + $0xb8] sm:$0xff]   ;;  %v2736_v31 = vmov 0  }
 0x3f8   : > { %v2298_v35 = vpop.f32.mrb[51].mxu0  ;;  %2662 = vset.pattern.permute.xlu0 %v2736_v31  ;;  %2663 = vset.pattern.permute.xlu1 %v2736_v31  ;;  %v1903_v31 = vld [vmem:[%s3263_s7 + $0x78] sm:$0xff] }
 0x3f9   : > { %v1322_v36 = vadd.f32 %v2296_v32, %v3042_v27  ;;  %v2299_v6 = vadd.f32 %v2298_v35, %v2297_v33  ;;  %2549 = vmatprep.subr.bf16.mxu1 %v3064_v34  ;;  %v1757_v32 = vld [vmem:[%s3151_s26 + $0x10] sm:$0xff]  ;;  %v1756_v33 = vld [vmem:[%s3151_s26 + $0x8] sm:$0xff]  ;;  %v1758_v35 = vld [vmem:[%s3151_s26 + $0x18] sm:$0xff] }
 0x3fa   : > { %2550 = vmatpush3.bf16.msra.mxu1 %v3064_v34  ;;  %1783 = vperm.xlu1 %2663, %v1757_v32   ;;  %v2739_v32 = vmov 0.0  }
 0x3fb   : > { %v1325_v37 = vadd.f32 %v2299_v6, %v3042_v27  ;;  %v1360_v38 = vmax.f32 %v1322_v36, 0.0  ;;  %v1759_v36 = vld [vmem:[%s3151_s26 + $0x20] sm:$0xff]  ;;  %v1760_v6 = vld [vmem:[%s3151_s26 + $0x28] sm:$0xff]  ;;  %2607 = vmatprep.mubr.msk.f32.mxu0 %vm2738_vm0, %v2739_v32 }
 0x3fd   : > { %v1361_v39 = vmax.f32 %v1325_v37, 0.0  ;;  %v2300_v42 = vpop.f32.mrb[52].mxu0  ;;  %v1761_v37 = vld [vmem:[%s3151_s26 + $0x30] sm:$0xff] }
 0x3fe   : > { %v2301_v43 = vpop.f32.mrb[53].mxu0  ;;  %1788 = vperm.xlu1 %2663, %v1758_v35  }
 0x3ff   : > { %v2302_v5 = vadd.f32 %v2301_v43, %v2300_v42  ;;  %v2303_v44 = vpop.f32.mrb[54].mxu0  ;;  %v3070_v26 = vpack.c.bf16 %v1361_v39, %v1360_v38  ;;  %v1762_v38 = vld [vmem:[%s3151_s26 + $0x38] sm:$0xff]  ;;  %v1763_v39 = vld [vmem:[%s3151_s26 + $0x40] sm:$0xff]  ;;  %v1764_v42 = vld [vmem:[%s3151_s26 + $0x48] sm:$0xff] }
 0x400   : > { %v2304_v45 = vpop.f32.mrb[55].mxu0  ;;  %v1765_v43 = vld [vmem:[%s3151_s26 + $0x50] sm:$0xff] }
 0x401   : > { %v1330_v46 = vadd.f32 %v2302_v5, %v3042_v27  ;;  %v2305_v41 = vadd.f32 %v2304_v45, %v2303_v44  ;;  %2551 = vmatprep.subr.bf16.mxu1 %v3070_v26  ;;  %v1766_v5 = vld [vmem:[%s3151_s26 + $0x58] sm:$0xff]  ;;  %v1767_v44 = vld [vmem:[%s3151_s26 + $0x60] sm:$0xff]  ;;  %v1768_v45 = vld [vmem:[%s3151_s26 + $0x68] sm:$0xff] }
 0x402   : > { %2552 = vmatpush3.bf16.msra.mxu1 %v3070_v26  ;;  %1798 = vperm.xlu1 %2663, %v1760_v6   ;;  %v3228_v6 = vld [vmem:[%s3262_s6 + $0x1] ss:$0 sm:$0xff] }
 0x403   : > { %v1333_v47 = vadd.f32 %v2305_v41, %v3042_v27  ;;  %v1362_v40 = vmax.f32 %v1330_v46, 0.0  ;;  %v1769_v46 = vld [vmem:[%s3151_s26 + $0x70] sm:$0xff]  ;;  %v1770_v41 = vld [vmem:[%s3151_s26 + $0x78] sm:$0xff] }
 0x405   : > { %v1363_v48 = vmax.f32 %v1333_v47, 0.0  ;;  %v2306_v49 = vpop.f32.mrb[56].mxu0 }
 0x406   : > { %v2307_v50 = vpop.f32.mrb[57].mxu0  ;;  %1808 = vperm.xlu1 %2663, %v1762_v38  }
 0x407   : > { %v2308_v51 = vadd.f32 %v2307_v50, %v2306_v49  ;;  %v2309_v52 = vpop.f32.mrb[58].mxu0  ;;  %v3076_v53 = vpack.c.bf16 %v1363_v48, %v1362_v40 }
 0x408   : > { %v2310_v55 = vpop.f32.mrb[59].mxu0 }
 0x409   : > { %v1338_v56 = vadd.f32 %v2308_v51, %v3042_v27  ;;  %v2311_v57 = vadd.f32 %v2310_v55, %v2309_v52  ;;  %2553 = vmatprep.subr.bf16.mxu1 %v3076_v53 }
 0x40a   : > { %2554 = vmatpush3.bf16.msra.mxu1 %v3076_v53  ;;  %1818 = vperm.xlu1 %2663, %v1764_v42  }
 0x40b   : > { %v1341_v58 = vadd.f32 %v2311_v57, %v3042_v27  ;;  %v1364_v59 = vmax.f32 %v1338_v56, 0.0 }
 0x40d   : > { %v1365_v60 = vmax.f32 %v1341_v58, 0.0  ;;  %v2312_v61 = vpop.f32.mrb[60].mxu0 }
 0x40e   : > { %v2313_v62 = vpop.f32.mrb[61].mxu0  ;;  %1828 = vperm.xlu1 %2663, %v1766_v5  }
 0x40f   : > { %v2314_v63 = vadd.f32 %v2313_v62, %v2312_v61  ;;  %v2315_v0 = vpop.f32.mrb[62].mxu0  ;;  %v3082_v2 = vpack.c.bf16 %v1365_v60, %v1364_v59 }
 0x410   : > { %v2316_v3 = vpop.f32.mrb[63].mxu0 }
 0x411   : > { %v1346_v4 = vadd.f32 %v2314_v63, %v3042_v27  ;;  %v2317_v7 = vadd.f32 %v2316_v3, %v2315_v0  ;;  %2555 = vmatprep.subr.bf16.mxu1 %v3082_v2 }
 0x412   : > { %2556 = vmatpush3.bf16.msra.mxu1 %v3082_v2  ;;  %1838 = vperm.xlu1 %2663, %v1768_v45  }
 0x413   : > { %v1349_v8 = vadd.f32 %v2317_v7, %v3042_v27  ;;  %v1366_v9 = vmax.f32 %v1346_v4, 0.0  ;;  %v2714_v27 = vld [vmem:[%s3261_s5 + $0xc8] sm:$0xff]  }
 0x415   : > { %v1367_v10 = vmax.f32 %v1349_v8, 0.0 }
 0x416   : > { %1848 = vperm.xlu1 %2663, %v1770_v41  }
 0x417   : > { %v3088_v11 = vpack.c.bf16 %v1367_v10, %v1366_v9 }
 0x419   : > { %2557 = vmatprep.subr.bf16.mxu1 %v3088_v11 }
 0x41a   : > { %2558 = vmatpush3.bf16.msra.mxu1 %v3088_v11 }
 0x41b   : > { %2334 = vmatprep.subr.bf16.mxu1 %v2712_v12  ;;  %v1892_v12 = vld [vmem:[%s3263_s7 + $0x20] sm:$0xff] }
 0x41d   : > { %2560 = vmatmul.mubr.bf16.vlgmr.msra.gmra.mrb[16].mxu1 %v2876_v16  ;;  %v2718_v16 = vld [vmem:[%s3261_s5 + $0xd8] sm:$0xff]  }
 0x41e   : > { %2563 = vmatprep.mubr.bf16.mxu1 %v2879_v17  ;;  %2335 = vmatpush3.bf16.msra.mxu1 %v2713_v13  ;;  %v2719_v17 = vld [vmem:[%s3261_s5 + $0x98] sm:$0xff]   ;;  %v1893_v13 = vld [vmem:[%s3263_s7 + $0x28] sm:$0xff] }
 0x41f   : > { %2336 = vmatprep.subr.bf16.mxu1 %v2714_v27  ;;  %v2617_v27 = vpack.c.bf16 %v1893_v13, %v1892_v12 }
 0x422   : > { %2337 = vmatpush3.bf16.msra.mxu1 %v2715_v15  ;;  %v1894_v15 = vld [vmem:[%s3263_s7 + $0x30] sm:$0xff] }
 0x423   : > { %2338 = vmatprep.subr.bf16.mxu1 %v2716_v23  ;;  %v1895_v23 = vld [vmem:[%s3263_s7 + $0x38] sm:$0xff] }
 0x425   : > { %2564 = vmatmul.mubr.bf16.gmra.mrb[20].mxu1 %v2885_v18  ;;  %v2722_v18 = vld [vmem:[%s3261_s5 + $0xe8] sm:$0xff]  }
 0x426   : > { %2567 = vmatprep.mubr.bf16.mxu1 %v2888_v19  ;;  %2339 = vmatpush3.bf16.msra.mxu1 %v2717_v24  ;;  %v2723_v19 = vld [vmem:[%s3261_s5 + $0xa8] sm:$0xff]   ;;  %v2620_v24 = vpack.c.bf16 %v1895_v23, %v1894_v15 }
 0x427   : > { %2340 = vmatprep.subr.bf16.mxu1 %v2718_v16  ;;  %v1896_v16 = vld [vmem:[%s3263_s7 + $0x40] sm:$0xff] }
 0x42a   : > { %2341 = vmatpush3.bf16.msra.mxu1 %v2719_v17  ;;  %v1897_v17 = vld [vmem:[%s3263_s7 + $0x48] sm:$0xff] }
 0x42b   : > { %2342 = vmatprep.subr.bf16.mxu1 %v2720_v25  ;;  %v2623_v25 = vpack.c.bf16 %v1897_v17, %v1896_v16 }
 0x42d   : > { %2568 = vmatmul.mubr.bf16.gmra.mrb[24].mxu1 %v2893_v20  ;;  %v2725_v20 = vld [vmem:[%s3261_s5 + $0xb0] sm:$0xff]  }
 0x42e   : > { %2571 = vmatprep.mubr.bf16.mxu1 %v2896_v21  ;;  %2343 = vmatpush3.bf16.msra.mxu1 %v2721_v28  ;;  %v2726_v21 = vld [vmem:[%s3261_s5 + $0xf8] sm:$0xff]   ;;  %v1898_v28 = vld [vmem:[%s3263_s7 + $0x50] sm:$0xff] }
 0x42f   : > { %2344 = vmatprep.subr.bf16.mxu1 %v2722_v18  ;;  %v1899_v18 = vld [vmem:[%s3263_s7 + $0x58] sm:$0xff] }
 0x432   : > { %2345 = vmatpush3.bf16.msra.mxu1 %v2723_v19  ;;  %v2626_v19 = vpack.c.bf16 %v1899_v18, %v1898_v28 }
 0x433   : > { %2346 = vmatprep.subr.bf16.mxu1 %v2724_v29  ;;  %v1900_v29 = vld [vmem:[%s3263_s7 + $0x60] sm:$0xff] }
 0x435   : > { %2572 = vmatmul.mubr.bf16.gmra.mrb[28].mxu1 %v2901_v22  ;;  %v1755_v22 = vld [vmem:[%s3151_s26] sm:$0xff] }
 0x436   : > { %2347 = vmatpush3.bf16.msra.mxu1 %v2725_v20  ;;  %1773 = vperm.xlu0 %2662, %v1755_v22   ;;  %v1901_v20 = vld [vmem:[%s3263_s7 + $0x68] sm:$0xff] }
 0x437   : > { %2348 = vmatprep.subr.bf16.mxu1 %v2726_v21  ;;  %v2629_v21 = vpack.c.bf16 %v1901_v20, %v1900_v29 }
 0x43a   : > { %2349 = vmatpush3.bf16.msra.mxu1 %v2727_v30  ;;  %1778 = vperm.xlu0 %2662, %v1756_v33   ;;  %v1902_v30 = vld [vmem:[%s3263_s7 + $0x70] sm:$0xff] }
 0x43b   : > { %v2632_v22 = vpack.c.bf16 %v1903_v31, %v1902_v30 }
 0x43e   : > { %1793 = vperm.xlu0 %2662, %v1759_v36  }
 0x442   : > { %1803 = vperm.xlu0 %2662, %v1761_v37  }
 0x446   : > { %1813 = vperm.xlu0 %2662, %v1763_v39  }
 0x44a   : > { %1823 = vperm.xlu0 %2662, %v1765_v43  }
 0x44e   : > { %1833 = vperm.xlu0 %2662, %v1767_v44  }
 0x452   : > { %1843 = vperm.xlu0 %2662, %v1769_v46  }
 0x4b5   : > { %v1774_v33 = vpop.permute.xlu0 %1773 }
 0x4b9   : > { %v1779_v5 = vpop.permute.xlu0 %1778 }
 0x4f0   : > { %v2561_v47 = vpop.f32.mrb[16].mxu1 }
 0x4f1   : > { %v1426_v40 = vpop.f32.mrb[17].mxu1 }
 0x4f2   : > { %v2562_v48 = vpop.f32.mrb[18].mxu1 }
 0x4f3   : > { %v1490_v49 = vpack.c.bf16 %v2562_v48, %v2561_v47  ;;  %v1429_v50 = vpop.f32.mrb[19].mxu1  ;;  %v1784_v47 = vpop.permute.xlu1 %1783 }
 0x4f4   : > { %v1489_v51 = vpack.c.bf16 %v1429_v50, %v1426_v40 }
 0x4f6   : > { %1690 = vmatprep.mubr.bf16.mxu1 %v1489_v51 }
 0x4f7   : > { %1691 = vmatmul.mubr.bf16.vlgmr.msra.gmra.mrb[32].mxu1 %v3046_v54 }
 0x4f8   : > { %1698 = vmatprep.mubr.bf16.mxu1 %v1490_v49  ;;  %v2565_v52 = vpop.f32.mrb[20].mxu1 }
 0x4f9   : > { %v1442_v55 = vpop.f32.mrb[21].mxu1 }
 0x4fa   : > { %v2566_v56 = vpop.f32.mrb[22].mxu1 }
 0x4fb   : > { %v1492_v57 = vpack.c.bf16 %v2566_v56, %v2565_v52  ;;  %v1445_v58 = vpop.f32.mrb[23].mxu1 }
 0x4fc   : > { %v1491_v59 = vpack.c.bf16 %v1445_v58, %v1442_v55  ;;  %v1789_v58 = vpop.permute.xlu1 %1788 }
 0x4ff   : > { %1699 = vmatmul.mubr.bf16.gmra.mrb[36].mxu1 %v3052_v1  ;;  %v2737_v1 = vmov 0.0|0.0  }
 0x500   : > { %1706 = vmatprep.mubr.bf16.mxu1 %v1491_v59  ;;  %v2569_v60 = vpop.f32.mrb[24].mxu1  ;;  %2610 = vmatprep.subr.bf16.mxu0 %v2737_v1 }
 0x501   : > { %v1458_v61 = vpop.f32.mrb[25].mxu1 }
 0x502   : > { %v2570_v62 = vpop.f32.mrb[26].mxu1 }
 0x503   : > { %v1494_v63 = vpack.c.bf16 %v2570_v62, %v2569_v60  ;;  %v1461_v0 = vpop.f32.mrb[27].mxu1 }
 0x504   : > { %v1493_v3 = vpack.c.bf16 %v1461_v0, %v1458_v61 }
 0x507   : > { %1707 = vmatmul.mubr.bf16.gmra.mrb[40].mxu1 %v3058_v14  ;;  %v1888_v14 = vld [vmem:[%s3263_s7] sm:$0xff] }
 0x508   : > { %1714 = vmatprep.mubr.bf16.mxu1 %v1492_v57  ;;  %v2573_v54 = vpop.f32.mrb[28].mxu1 }
 0x509   : > { %v1474_v4 = vpop.f32.mrb[29].mxu1 }
 0x50a   : > { %v2574_v7 = vpop.f32.mrb[30].mxu1 }
 0x50b   : > { %v1496_v8 = vpack.c.bf16 %v2574_v7, %v2573_v54  ;;  %v1477_v9 = vpop.f32.mrb[31].mxu1 }
 0x50c   : > { %v1495_v10 = vpack.c.bf16 %v1477_v9, %v1474_v4 }
 0x50f   : > { %1715 = vmatmul.mubr.bf16.gmra.mrb[44].mxu1 %v3064_v34  ;;  %v1889_v34 = vld [vmem:[%s3263_s7 + $0x8] sm:$0xff] }
 0x510   : > { %1722 = vmatprep.mubr.bf16.mxu1 %v1493_v3 }
 0x517   : > { %1723 = vmatmul.mubr.bf16.gmra.mrb[48].mxu1 %v3070_v26  ;;  %v2611_v26 = vpack.c.bf16 %v1889_v34, %v1888_v14 }
 0x518   : > { %1730 = vmatprep.mubr.bf16.mxu1 %v1494_v63 }
 0x519   : > { %2612 = vmatpush3.bf16.msra.mxu0 %v2611_v26 }
 0x51a   : > { %2613 = vmatprep.subr.bf16.mxu0 %v2737_v1 }
 0x51f   : > { %1731 = vmatmul.mubr.bf16.gmra.mrb[52].mxu1 %v3076_v53  ;;  %v1890_v53 = vld [vmem:[%s3263_s7 + $0x10] sm:$0xff] }
 0x520   : > { %1738 = vmatprep.mubr.bf16.mxu1 %v1495_v10 }
 0x527   : > { %1739 = vmatmul.mubr.bf16.gmra.mrb[56].mxu1 %v3082_v2  ;;  %v1891_v2 = vld [vmem:[%s3263_s7 + $0x18] sm:$0xff] }
 0x528   : > { %1746 = vmatprep.mubr.bf16.mxu1 %v1496_v8  ;;  %v1794_v8 = vpop.permute.xlu0 %1793 }
 0x52c   : > { %v1804_v23 = vpop.permute.xlu0 %1803 }
 0x52f   : > { %1747 = vmatmul.mubr.bf16.gmra.mrb[60].mxu1 %v3088_v11  ;;  %v2614_v11 = vpack.c.bf16 %v1891_v2, %v1890_v53 }
 0x530   : > { %v1814_v32 = vpop.permute.xlu0 %1813 }
 0x531   : > { %2615 = vmatpush3.bf16.msra.mxu0 %v2614_v11 }
 0x532   : > { %2616 = vmatprep.subr.bf16.mxu0 %v2737_v1 }
 0x535   : > { %2618 = vmatpush3.bf16.msra.mxu0 %v2617_v27 }
 0x536   : > { %2619 = vmatprep.subr.bf16.mxu0 %v2737_v1 }
 0x539   : > { %2621 = vmatpush3.bf16.msra.mxu0 %v2620_v24 }
 0x53a   : > { %2622 = vmatprep.subr.bf16.mxu0 %v2737_v1 }
 0x53d   : > { %2624 = vmatpush3.bf16.msra.mxu0 %v2623_v25 }
 0x53e   : > { %2625 = vmatprep.subr.bf16.mxu0 %v2737_v1 }
 0x541   : > { %2627 = vmatpush3.bf16.msra.mxu0 %v2626_v19 }
 0x542   : > { %2628 = vmatprep.subr.bf16.mxu0 %v2737_v1 }
 0x545   : > { %2630 = vmatpush3.bf16.msra.mxu0 %v2629_v21 }
 0x546   : > { %2631 = vmatprep.subr.bf16.mxu0 %v2737_v1  ;;  %v1799_v1 = vpop.permute.xlu1 %1798 }
 0x549   : > { %2633 = vmatpush3.bf16.msra.mxu0 %v2632_v22 }
 0x54a   : > { %v1809_v17 = vpop.permute.xlu1 %1808 }
 0x5ca   : > { %v2350_v35 = vpop.f32.mrb[32].mxu1 }
 0x5cb   : > { %v2351_v36 = vpop.f32.mrb[33].mxu1 }
 0x5cc   : > { %v2352_v37 = vadd.f32 %v2351_v36, %v2350_v35  ;;  %v2353_v38 = vpop.f32.mrb[34].mxu1  ;;  %v1819_v36 = vpop.permute.xlu1 %1818 }
 0x5cd   : > { %v2354_v39 = vpop.f32.mrb[35].mxu1 }
 0x5ce   : > { %v1693_v42 = vadd.f32 %v2352_v37, %v3228_v6  ;;  %v2355_v43 = vadd.f32 %v2354_v39, %v2353_v38 }
 0x5d0   : > { %v1696_v44 = vadd.f32 %v2355_v43, %v3228_v6  ;;  %v1851_v45 = vmul.f32 %v1774_v33, %v1693_v42 }
 0x5d2   : > { %v1852_v46 = vmul.f32 %v1779_v5, %v1696_v44  ;;  %v2356_v41 = vpop.f32.mrb[36].mxu1 }
 0x5d3   : > { %v2357_v40 = vpop.f32.mrb[37].mxu1 }
 0x5d4   : > { %v1867_v48 = vadd.f32 %v1852_v46, %v1851_v45  ;;  %v2358_v49 = vadd.f32 %v2357_v40, %v2356_v41  ;;  %v2359_v50 = vpop.f32.mrb[38].mxu1 }
 0x5d5   : > { %v2360_v51 = vpop.f32.mrb[39].mxu1 }
 0x5d6   : > { %v1701_v52 = vadd.f32 %v2358_v49, %v3228_v6  ;;  %v2361_v55 = vadd.f32 %v2360_v51, %v2359_v50  ;;  %v1829_v49 = vpop.permute.xlu1 %1828 }
 0x5d8   : > { %v1853_v56 = vmul.f32 %v1784_v47, %v1701_v52  ;;  %v1704_v57 = vadd.f32 %v2361_v55, %v3228_v6  ;;  %v1824_v47 = vpop.permute.xlu0 %1823 }
 0x5da   : > { %v1854_v59 = vmul.f32 %v1789_v58, %v1704_v57  ;;  %v1868_v60 = vadd.f32 %v1867_v48, %v1853_v56  ;;  %v2362_v61 = vpop.f32.mrb[40].mxu1 }
 0x5db   : > { %v2363_v62 = vpop.f32.mrb[41].mxu1 }
 0x5dc   : > { %v1869_v63 = vadd.f32 %v1868_v60, %v1854_v59  ;;  %v2364_v0 = vadd.f32 %v2363_v62, %v2362_v61  ;;  %v2365_v3 = vpop.f32.mrb[42].mxu1  ;;  %v1834_v62 = vpop.permute.xlu0 %1833 }
 0x5dd   : > { %v2366_v54 = vpop.f32.mrb[43].mxu1 }
 0x5de   : > { %v1709_v4 = vadd.f32 %v2364_v0, %v3228_v6  ;;  %v2367_v7 = vadd.f32 %v2366_v54, %v2365_v3  ;;  %v1839_v3 = vpop.permute.xlu1 %1838 }
 0x5e0   : > { %v1855_v9 = vmul.f32 %v1794_v8, %v1709_v4  ;;  %v1712_v10 = vadd.f32 %v2367_v7, %v3228_v6 }
 0x5e2   : > { %v1870_v14 = vadd.f32 %v1869_v63, %v1855_v9  ;;  %v1856_v34 = vmul.f32 %v1799_v1, %v1712_v10  ;;  %v2368_v26 = vpop.f32.mrb[44].mxu1 }
 0x5e3   : > { %v2369_v53 = vpop.f32.mrb[45].mxu1 }
 0x5e4   : > { %v1871_v2 = vadd.f32 %v1870_v14, %v1856_v34  ;;  %v2370_v11 = vadd.f32 %v2369_v53, %v2368_v26  ;;  %v2371_v12 = vpop.f32.mrb[46].mxu1  ;;  %v1844_v53 = vpop.permute.xlu0 %1843 }
 0x5e5   : > { %v2372_v13 = vpop.f32.mrb[47].mxu1 }
 0x5e6   : > { %v1717_v27 = vadd.f32 %v2370_v11, %v3228_v6  ;;  %v2373_v15 = vadd.f32 %v2372_v13, %v2371_v12  ;;  %v1849_v12 = vpop.permute.xlu1 %1848 }
 0x5e8   : > { %v1857_v24 = vmul.f32 %v1804_v23, %v1717_v27  ;;  %v1720_v16 = vadd.f32 %v2373_v15, %v3228_v6 }
 0x5ea   : > { %v1872_v25 = vadd.f32 %v1871_v2, %v1857_v24  ;;  %v1858_v28 = vmul.f32 %v1809_v17, %v1720_v16  ;;  %v2374_v18 = vpop.f32.mrb[48].mxu1 }
 0x5eb   : > { %v2375_v19 = vpop.f32.mrb[49].mxu1 }
 0x5ec   : > { %v1873_v29 = vadd.f32 %v1872_v25, %v1858_v28  ;;  %v2376_v20 = vadd.f32 %v2375_v19, %v2374_v18  ;;  %v2377_v21 = vpop.f32.mrb[50].mxu1  ;;  %v1975_v18 = vlaneseq }
 0x5ed   : > { %v2378_v30 = vpop.f32.mrb[51].mxu1 }
 0x5ee   : > { %v1725_v31 = vadd.f32 %v2376_v20, %v3228_v6  ;;  %v2379_v22 = vadd.f32 %v2378_v30, %v2377_v21  ;;  %v1976_v19 = vshrl.u32 %v1975_v18, 7 }
 0x5f0   : > { %v1859_v33 = vmul.f32 %v1814_v32, %v1725_v31  ;;  %v1728_v35 = vadd.f32 %v2379_v22, %v3228_v6  ;;  %v1977_v20 = vsub.s32 0, %v1976_v19 }
 0x5f2   : > { %v1874_v37 = vadd.f32 %v1873_v29, %v1859_v33  ;;  %v1860_v38 = vmul.f32 %v1819_v36, %v1728_v35  ;;  %v2380_v39 = vpop.f32.mrb[52].mxu1  ;;  %v1904_v29 = vld [vmem:[%s3264_s8] sm:$0x1] }
 0x5f3   : > { %v2381_v42 = vpop.f32.mrb[53].mxu1 }
 0x5f4   : > { %v1875_v43 = vadd.f32 %v1874_v37, %v1860_v38  ;;  %v2382_v5 = vadd.f32 %v2381_v42, %v2380_v39  ;;  %v2383_v44 = vpop.f32.mrb[54].mxu1 }
 0x5f5   : > { %v2384_v45 = vpop.f32.mrb[55].mxu1 }
 0x5f6   : > { %v1733_v46 = vadd.f32 %v2382_v5, %v3228_v6  ;;  %v2385_v41 = vadd.f32 %v2384_v45, %v2383_v44 }
 0x5f8   : > { %v1861_v40 = vmul.f32 %v1824_v47, %v1733_v46  ;;  %v1736_v48 = vadd.f32 %v2385_v41, %v3228_v6 }
 0x5fa   : > { %v1876_v50 = vadd.f32 %v1875_v43, %v1861_v40  ;;  %v1862_v51 = vmul.f32 %v1829_v49, %v1736_v48  ;;  %v2386_v52 = vpop.f32.mrb[56].mxu1 }
 0x5fb   : > { %v2387_v55 = vpop.f32.mrb[57].mxu1 }
 0x5fc   : > { %v1877_v56 = vadd.f32 %v1876_v50, %v1862_v51  ;;  %v2388_v57 = vadd.f32 %v2387_v55, %v2386_v52  ;;  %v2389_v58 = vpop.f32.mrb[58].mxu1 }
 0x5fd   : > { %v2390_v59 = vpop.f32.mrb[59].mxu1 }
 0x5fe   : > { %v1741_v60 = vadd.f32 %v2388_v57, %v3228_v6  ;;  %v2391_v61 = vadd.f32 %v2390_v59, %v2389_v58 }
 0x600   : > { %v1863_v63 = vmul.f32 %v1834_v62, %v1741_v60  ;;  %v1744_v0 = vadd.f32 %v2391_v61, %v3228_v6 }
 0x602   : > { %v1878_v54 = vadd.f32 %v1877_v56, %v1863_v63  ;;  %v1864_v4 = vmul.f32 %v1839_v3, %v1744_v0  ;;  %v2392_v7 = vpop.f32.mrb[60].mxu1 }
 0x603   : > { %v2393_v8 = vpop.f32.mrb[61].mxu1 }
 0x604   : > { %v1879_v9 = vadd.f32 %v1878_v54, %v1864_v4  ;;  %v2394_v10 = vadd.f32 %v2393_v8, %v2392_v7  ;;  %v2395_v1 = vpop.f32.mrb[62].mxu1 }
 0x605   : > { %v2396_v14 = vpop.f32.mrb[63].mxu1 }
 0x606   : > { %v1749_v34 = vadd.f32 %v2394_v10, %v3228_v6  ;;  %v2397_v26 = vadd.f32 %v2396_v14, %v2395_v1 }
 0x608   : > { %v1865_v2 = vmul.f32 %v1844_v53, %v1749_v34  ;;  %v1752_v11 = vadd.f32 %v2397_v26, %v3228_v6 }
 0x60a   : > { %v1880_v13 = vadd.f32 %v1879_v9, %v1865_v2  ;;  %v1866_v27 = vmul.f32 %v1849_v12, %v1752_v11 }
 0x60c   : > { %v1881_v15 = vadd.f32 %v1880_v13, %v1866_v27 }
 0x60e   : > { %v1882_v23 = vrot.slane %v1881_v15, 4 }
 0x610   : > { %v1883_v24 = vadd.f32 %v1882_v23, %v1881_v15 }
 0x612   : > { %v1884_v16 = vrot.slane %v1883_v24, 2 }
 0x614   : > { %v1885_v17 = vadd.f32 %v1884_v16, %v1883_v24 }
 0x616   : > { %v1886_v25 = vrot.slane %v1885_v17, 1 }
 0x618   : > { %v1887_v28 = vadd.f32 %v1886_v25, %v1885_v17 }
 0x61a   : > { %2608 = vmatmul.mubr.f32.vlgmr.msra.gmra.mrb[64].mxu0 %v1887_v28 }
 0x6ed   : > { %v1971_v6 = vpop.f32.mrb[64].mxu0 }
 0x6ee   : > { %v1972_v21 = vadd.f32 %v1971_v6, %v1904_v29  ;;  %v2609_v30 = vpop.f32.mrb[65].mxu0 }
 0x6f0   : > { %v1978_v31 = vrot.slane %v1972_v21, %v1977_v20 }
 0x6f2   : > { %1979 = vst [vmem:[%s370_s28] sm:$0xff] %v1978_v31 }
 0x6f3 PF: > { %s19_s30 = sadd.s32 1, %s2734_s30  }
 0x6f4   : > { %p16_p4 = scmp.ge.s32.totalorder %s19_s30, 4  }
 0x6f6   :  { %18 = sbr.rel (!%p16_p4) target bundleno = 1 (0x1), region = 95 }

</bundles_post_ra>
